<compile_context>
chip_gen: v5e
topology: v5e:2x2
jax: 0.10.0
libtpu: 0.0.40
codegen_flags: <defaults>
</compile_context>

<pallas_src>
import math
from functools import partial

import jax
import jax.numpy as jnp
from jax.experimental import pallas as pl
from jax.experimental.pallas import tpu as pltpu


# ------------------------------------------------------------------ kernel ----
def _relation_module_kernel(n_rel,
                            t_ref, tmask_ref, v_ref, b_ref, vmr_ref,
                            w_ref, bias_ref, bc_ref,
                            out_ref):
    bs, St, H = t_ref.shape
    No = v_ref.shape[1]
    D = H // n_rel
    nn2 = No * No
    Bh = bs * n_rel
    f32 = jnp.float32

    # static offsets into the packed weight / bias blobs
    W_WM, W_WG, W_WKQV = 0, nn2, nn2 + 2 * H
    B_WC, B_BM, B_BG, B_BKQV = 0, H, H + nn2, H + nn2 + 2 * H

    # ---------------- stage 1: text summary -> t_map_obj (stays in VMEM) ------
    tm = t_ref[...] * tmask_ref[...]                       # (bs, St, H); padded rows -> 0
    wc = bias_ref[0:1, B_WC:B_WC + H]                      # (1, H)
    # t_compress as VPU multiply + lane reduction.  The reference's -inf mask before
    # sigmoid is unnecessary: padded rows of tm are zero, so their sigmoid never counts.
    tc = jnp.sum(tm * wc, axis=-1, keepdims=True) + bc_ref[0, 0]     # (bs, St, 1)
    ss = jax.nn.sigmoid(tc)
    tsum = jnp.sum(tm * ss, axis=1)                        # (bs, H)  batched reduce

    wm = w_ref[:, W_WM:W_WM + nn2]                         # (H, No*No)
    bm = bias_ref[0:1, B_BM:B_BM + nn2]
    tmap = jax.lax.dot_general(tsum, wm, (((1,), (0,)), ((), ())),
                               preferred_element_type=f32) + bm
    tmap = jnp.maximum(tmap, 0.0).reshape(bs, 1, No, No)   # broadcast over heads

    # ---------------- stage 2: fused, head-major projections ------------------
    v3 = v_ref[...]                                        # (bs, No, H)
    v_flat = v3.reshape(bs * No, H)
    b_flat = b_ref[...].reshape(bs * No, H)

    wg = w_ref[:, W_WG:W_WG + 2 * H]                       # per head r: [G1_r | G2_r]
    bg = bias_ref[0:1, B_BG:B_BG + 2 * H]
    wkqv = w_ref[:, W_WKQV:W_WKQV + 3 * H]                 # per head r: [K_r | Q_r/sqrt(dk) | V_r]
    bkqv = bias_ref[0:1, B_BKQV:B_BKQV + 3 * H]

    proj_g = jax.lax.dot_general(b_flat, wg, (((1,), (0,)), ((), ())),
                                 preferred_element_type=f32) + bg        # (bs*No, 2H)
    proj_kqv = jax.lax.dot_general(v_flat, wkqv, (((1,), (0,)), ((), ())),
                                   preferred_element_type=f32) + bkqv    # (bs*No, 3H)

    # one relayout to head-batched form: (bs*n_rel, No, ...)
    vm_row = vmr_ref[...]                                  # (bs, 1, No), 1 = valid
    vm_col = vm_row.reshape(bs, 1, No, 1)                  # row scaling, geometry path
    proj_g = (proj_g.reshape(bs, No, n_rel, 2 * D).transpose(0, 2, 1, 3)
              * vm_col).reshape(Bh, No, 2 * D)
    proj_kqv = proj_kqv.reshape(bs, No, n_rel, 3 * D).transpose(0, 2, 1, 3) \
                       .reshape(Bh, No, 3 * D)

    g1 = proj_g[..., 0:D]
    g2 = proj_g[..., D:2 * D]
    k = proj_kqv[..., 0:D]
    q = proj_kqv[..., D:2 * D]                             # already scaled by 1/sqrt(dk)
    wv = proj_kqv[..., 2 * D:3 * D]

    # ---------------- all (batch, head) attentions at once --------------------
    w_g = jnp.einsum("bid,bjd->bij", g1, g2,
                     preferred_element_type=f32).reshape(bs, n_rel, No, No)
    w_g = jnp.maximum(w_g, 0.0) + tmap
    sd = jnp.einsum("bid,bjd->bij", k, q,
                    preferred_element_type=f32).reshape(bs, n_rel, No, No)

    # additive padding mask (0 valid, -1e30 padded): no inf arithmetic, one add.
    # (Also guards fully-padded rows against NaN, unlike the -inf reference path.)
    mask_bias = ((vm_row - 1.0) * 1e30).reshape(bs, 1, 1, No)
    logits = jnp.log(jnp.maximum(w_g, 1e-6)) + sd + mask_bias

    m = jnp.max(logits, axis=-1, keepdims=True)
    p = jnp.exp(logits - m)
    # exact reciprocal keeps the tolerance tight; approx=True is a further free win
    # when ~1e-3 softmax tolerance is acceptable.
    attn = p * pl.reciprocal(jnp.sum(p, axis=-1, keepdims=True), approx=False)

    head = jnp.einsum("bij,bjd->bid", attn.reshape(Bh, No, No), wv,
                      preferred_element_type=f32)          # (Bh, No, D)

    # single coalesced store: un-head, add residual, write the whole output once.
    out = head.reshape(bs, n_rel, No, D).transpose(0, 2, 1, 3).reshape(bs, No, H) + v3
    out_ref[...] = out.astype(out_ref.dtype)


# --------------------------------------------------- param-build-time packing --
def prepare_relation_params(params, *, n_relations, key_feature_dim):
    """One-time weight fusion / head-major reordering / blob packing."""
    H = params["wg1"].shape[0]
    D = H // n_relations
    scale = 1.0 / math.sqrt(key_feature_dim)

    def head_major(ws):
        parts = [w.reshape(w.shape[0], n_relations, D) for w in ws]
        return jnp.concatenate(parts, axis=-1).reshape(ws[0].shape[0], -1)

    wg_hm = head_major([params["wg1"], params["wg2"]])                       # (H, 2H)
    bg_hm = head_major([params["bg1"], params["bg2"]])                       # (1, 2H)
    wkqv_hm = head_major([params["wk"], params["wq"] * scale, params["wv"]])  # (H, 3H)
    bkqv_hm = head_major([params["bk"], params["bq"] * scale, params["bv"]])  # (1, 3H)

    w_blob = jnp.concatenate([params["wm"], wg_hm, wkqv_hm], axis=1)         # (H, No^2+5H)
    bias_blob = jnp.concatenate([params["wc"].reshape(1, H), params["bm"],
                                 bg_hm, bkqv_hm], axis=1)                    # (1, H+No^2+5H)
    return {"w_blob": w_blob, "bias_blob": bias_blob,
            "bc": params["bc"].reshape(1, 1)}


# ----------------------------------------------------------------- wrapper ----
def relation_module_forward(prepared, v, b, v_mask, t, t_mask, *, n_relations):
    bs, num_obj, hidden = v.shape
    tmask3 = t_mask[:, :, None].astype(jnp.float32)        # (bs, St, 1)
    vmask_row = v_mask[:, None, :].astype(jnp.float32)     # (bs, 1, No)

    vmem = pl.BlockSpec(memory_space=pltpu.MemorySpace.VMEM)
    smem = pl.BlockSpec(memory_space=pltpu.MemorySpace.SMEM)

    # Whole batch in one invocation (tiny working set).  For large bs: grid over batch
    # blocks marked "parallel" (uses both v7x TensorCores) and re-budget VMEM (64 MiB).
    kernel = partial(_relation_module_kernel, n_relations)
    return pl.pallas_call(
        kernel,
        out_shape=jax.ShapeDtypeStruct((bs, num_obj, hidden), jnp.float32),
        in_specs=[vmem, vmem, vmem, vmem, vmem,            # t, tmask, v, b, vmask_row
                  vmem, vmem, smem],                       # w_blob, bias_blob, bc
        out_specs=vmem,
    )(t, tmask3, v, b, vmask_row,
      prepared["w_blob"], prepared["bias_blob"], prepared["bc"])


# -------------------------------------------------------- pure-JAX reference --
def reference_forward(params, v, b, v_mask, t, t_mask, *, n_relations, key_feature_dim):
    bs, num_obj, hidden = v.shape
    D = hidden // n_relations
    tm = t * t_mask[:, :, None]
    tc = tm @ params["wc"] + params["bc"]
    tc = jnp.where(t_mask[:, :, None] == 0, -jnp.inf, tc)
    ss = jax.nn.sigmoid(tc)
    tsum = jnp.einsum("bsh,bso->bh", tm, ss)
    tmap = jax.nn.relu(tsum @ params["wm"] + params["bm"]).reshape(bs, num_obj, num_obj)

    def shape(x):
        return x.reshape(bs, num_obj, n_relations, D).transpose(0, 2, 1, 3)

    wg1 = (b @ params["wg1"] + params["bg1"]) * v_mask[:, :, None]
    wg2 = (b @ params["wg2"] + params["bg2"]) * v_mask[:, :, None]
    g1, g2 = shape(wg1), shape(wg2)
    w_g = jax.nn.relu(jnp.einsum("brid,brjd->brij", g1, g2)) + tmap[:, None]
    k = shape(v @ params["wk"] + params["bk"])
    q = shape(v @ params["wq"] + params["bq"])
    sd = jnp.einsum("brid,brjd->brij", k, q) / math.sqrt(key_feature_dim)
    w_mn = jnp.log(jnp.maximum(w_g, 1e-6)) + sd
    w_mn = jnp.where((v_mask == 0)[:, None, None, :], -jnp.inf, w_mn)
    w_mn = jax.nn.softmax(w_mn, axis=-1)
    wv = shape(v @ params["wv"] + params["bv"])
    out = jnp.einsum("brij,brjd->brid", w_mn, wv)
    out = out.transpose(0, 2, 1, 3).reshape(bs, num_obj, hidden)
    return out + v


# --------------------------------------------------------------------- main ---
if __name__ == "__main__":
    bs, num_obj, hidden, seq_t = 2, 8, 32, 8
    n_relations = 4
    key_feature_dim = hidden // n_relations   # RelationUnit's view requires dim_k == H // Nr
    # utils.output_size == num_obj so t_map_obj reshapes to (num_obj, num_obj)

    key = jax.random.PRNGKey(0)
    keys = jax.random.split(key, 20)

    def u(k, shape, scale=0.1):
        return jax.random.uniform(k, shape, jnp.float32, -scale, scale)

    nn2 = num_obj * num_obj
    params = {
        "wc": u(keys[0], (hidden, 1)),       "bc": u(keys[1], (1, 1)),
        "wm": u(keys[2], (hidden, nn2)),     "bm": u(keys[3], (1, nn2)),
        "wg1": u(keys[4], (hidden, hidden)), "bg1": u(keys[5], (1, hidden)),
        "wg2": u(keys[6], (hidden, hidden)), "bg2": u(keys[7], (1, hidden)),
        "wk": u(keys[8], (hidden, hidden)),  "bk": u(keys[9], (1, hidden)),
        "wq": u(keys[10], (hidden, hidden)), "bq": u(keys[11], (1, hidden)),
        "wv": u(keys[12], (hidden, hidden)), "bv": u(keys[13], (1, hidden)),
    }

    v = jax.random.normal(keys[14], (bs, num_obj, hidden), jnp.float32)
    b = jax.random.normal(keys[15], (bs, num_obj, hidden), jnp.float32)
    t = jax.random.normal(keys[16], (bs, seq_t, hidden), jnp.float32)
    # masks: 1 = valid, 0 = padded (at least one valid entry per row)
    v_mask = jnp.concatenate([jnp.ones((bs, 6)), jnp.zeros((bs, 2))], axis=1).astype(jnp.float32)
    t_mask = jnp.concatenate([jnp.ones((bs, 5)), jnp.zeros((bs, 3))], axis=1).astype(jnp.float32)

    prepared = prepare_relation_params(params, n_relations=n_relations,
                                       key_feature_dim=key_feature_dim)
    out = relation_module_forward(prepared, v, b, v_mask, t, t_mask,
                                  n_relations=n_relations)
    out = jax.block_until_ready(out)

    ref = reference_forward(params, v, b, v_mask, t, t_mask,
                            n_relations=n_relations,
                            key_feature_dim=key_feature_dim)
    assert out.shape == (bs, num_obj, hidden)
    max_err = float(jnp.max(jnp.abs(out - ref)))
    assert jnp.allclose(out, ref, atol=5e-4, rtol=5e-4), max_err
    print("KERNEL_OK")
</pallas_src>

<mosaic_0001>
module attributes {stable_mosaic.version = 11 : i64} {
  func.func @_relation_module_kernel(%arg0: memref<2x8x32xf32, #tpu.memory_space<vmem>>, %arg1: memref<2x8x1xf32, #tpu.memory_space<vmem>>, %arg2: memref<2x8x32xf32, #tpu.memory_space<vmem>>, %arg3: memref<2x8x32xf32, #tpu.memory_space<vmem>>, %arg4: memref<2x1x8xf32, #tpu.memory_space<vmem>>, %arg5: memref<32x224xf32, #tpu.memory_space<vmem>>, %arg6: memref<1x256xf32, #tpu.memory_space<vmem>>, %arg7: memref<1x1xf32, #tpu.memory_space<smem>>, %arg8: memref<2x8x32xf32, #tpu.memory_space<vmem>>) attributes {dimension_semantics = [], scalar_prefetch = 0 : i64, scratch_operands = 0 : i64, tpu.core_type = #tpu.core_type<tc>} {
    %c0 = arith.constant 0 : index
    %c0_0 = arith.constant 0 : index
    %c0_1 = arith.constant 0 : index
    %0 = vector.load %arg0[%c0, %c0_0, %c0_1] : memref<2x8x32xf32, #tpu.memory_space<vmem>>, vector<2x8x32xf32>
    %c0_2 = arith.constant 0 : index
    %c0_3 = arith.constant 0 : index
    %c0_4 = arith.constant 0 : index
    %1 = vector.load %arg1[%c0_2, %c0_3, %c0_4] : memref<2x8x1xf32, #tpu.memory_space<vmem>>, vector<2x8x1xf32>
    %2 = vector.broadcast %1 : vector<2x8x1xf32> to vector<2x8x32xf32>
    %3 = arith.mulf %0, %2 : vector<2x8x32xf32>
    %c0_5 = arith.constant 0 : index
    %c0_6 = arith.constant 0 : index
    %4 = vector.load %arg6[%c0_5, %c0_6] : memref<1x256xf32, #tpu.memory_space<vmem>>, vector<1x32xf32>
    %5 = vector.shape_cast %4 : vector<1x32xf32> to vector<1x1x32xf32>
    %6 = vector.broadcast %5 : vector<1x1x32xf32> to vector<2x8x32xf32>
    %7 = arith.mulf %3, %6 : vector<2x8x32xf32>
    %cst = arith.constant dense<0.000000e+00> : vector<2x8xf32>
    %8 = vector.multi_reduction <add>, %7, %cst [2] : vector<2x8x32xf32> to vector<2x8xf32>
    %9 = vector.shape_cast %8 : vector<2x8xf32> to vector<2x8x1xf32>
    %c0_7 = arith.constant 0 : index
    %c0_8 = arith.constant 0 : index
    %10 = memref.load %arg7[%c0_7, %c0_8] : memref<1x1xf32, #tpu.memory_space<smem>>
    %11 = vector.broadcast %10 : f32 to vector<2x8x1xf32>
    %12 = arith.addf %9, %11 : vector<2x8x1xf32>
    %13 = arith.negf %12 : vector<2x8x1xf32>
    %14 = math.exp %13 : vector<2x8x1xf32>
    %cst_9 = arith.constant 1.000000e+00 : f32
    %15 = vector.broadcast %cst_9 : f32 to vector<2x8x1xf32>
    %16 = arith.addf %15, %14 : vector<2x8x1xf32>
    %17 = arith.divf %15, %16 : vector<2x8x1xf32>
    %18 = vector.broadcast %17 : vector<2x8x1xf32> to vector<2x8x32xf32>
    %19 = arith.mulf %3, %18 : vector<2x8x32xf32>
    %cst_10 = arith.constant dense<0.000000e+00> : vector<2x32xf32>
    %20 = vector.multi_reduction <add>, %19, %cst_10 [1] : vector<2x8x32xf32> to vector<2x32xf32>
    %c0_11 = arith.constant 0 : index
    %c0_12 = arith.constant 0 : index
    %21 = vector.load %arg5[%c0_11, %c0_12] : memref<32x224xf32, #tpu.memory_space<vmem>>, vector<32x64xf32>
    %c0_13 = arith.constant 0 : index
    %c32 = arith.constant 32 : index
    %22 = vector.load %arg6[%c0_13, %c32] : memref<1x256xf32, #tpu.memory_space<vmem>>, vector<1x64xf32>
    %cst_14 = arith.constant dense<0.000000e+00> : vector<2x64xf32>
    %23 = tpu.matmul %20, %21, %cst_14 {dimension_numbers = #tpu.dot_dimension_numbers<[1], [0], [0], [1], [0, 0, 1, 1], [], []>} : vector<2x32xf32>, vector<32x64xf32>, vector<2x64xf32> -> vector<2x64xf32>
    %24 = vector.broadcast %22 : vector<1x64xf32> to vector<2x64xf32>
    %25 = arith.addf %23, %24 : vector<2x64xf32>
    %cst_15 = arith.constant 0.000000e+00 : f32
    %26 = vector.broadcast %cst_15 : f32 to vector<2x64xf32>
    %27 = arith.maximumf %25, %26 : vector<2x64xf32>
    %28 = vector.shape_cast %27 : vector<2x64xf32> to vector<2x1x8x8xf32>
    %c0_16 = arith.constant 0 : index
    %c0_17 = arith.constant 0 : index
    %c0_18 = arith.constant 0 : index
    %29 = vector.load %arg2[%c0_16, %c0_17, %c0_18] : memref<2x8x32xf32, #tpu.memory_space<vmem>>, vector<2x8x32xf32>
    %30 = vector.shape_cast %29 : vector<2x8x32xf32> to vector<16x32xf32>
    %c0_19 = arith.constant 0 : index
    %c0_20 = arith.constant 0 : index
    %c0_21 = arith.constant 0 : index
    %31 = vector.load %arg3[%c0_19, %c0_20, %c0_21] : memref<2x8x32xf32, #tpu.memory_space<vmem>>, vector<2x8x32xf32>
    %32 = vector.shape_cast %31 : vector<2x8x32xf32> to vector<16x32xf32>
    %c0_22 = arith.constant 0 : index
    %c64 = arith.constant 64 : index
    %33 = vector.load %arg5[%c0_22, %c64] : memref<32x224xf32, #tpu.memory_space<vmem>>, vector<32x64xf32>
    %c0_23 = arith.constant 0 : index
    %c96 = arith.constant 96 : index
    %34 = vector.load %arg6[%c0_23, %c96] : memref<1x256xf32, #tpu.memory_space<vmem>>, vector<1x64xf32>
    %c0_24 = arith.constant 0 : index
    %c128 = arith.constant 128 : index
    %35 = vector.load %arg5[%c0_24, %c128] : memref<32x224xf32, #tpu.memory_space<vmem>>, vector<32x96xf32>
    %c0_25 = arith.constant 0 : index
    %c160 = arith.constant 160 : index
    %36 = vector.load %arg6[%c0_25, %c160] : memref<1x256xf32, #tpu.memory_space<vmem>>, vector<1x96xf32>
    %cst_26 = arith.constant dense<0.000000e+00> : vector<16x64xf32>
    %37 = tpu.matmul %32, %33, %cst_26 {dimension_numbers = #tpu.dot_dimension_numbers<[1], [0], [0], [1], [0, 0, 1, 1], [], []>} : vector<16x32xf32>, vector<32x64xf32>, vector<16x64xf32> -> vector<16x64xf32>
    %38 = vector.broadcast %34 : vector<1x64xf32> to vector<16x64xf32>
    %39 = arith.addf %37, %38 : vector<16x64xf32>
    %cst_27 = arith.constant dense<0.000000e+00> : vector<16x96xf32>
    %40 = tpu.matmul %30, %35, %cst_27 {dimension_numbers = #tpu.dot_dimension_numbers<[1], [0], [0], [1], [0, 0, 1, 1], [], []>} : vector<16x32xf32>, vector<32x96xf32>, vector<16x96xf32> -> vector<16x96xf32>
    %41 = vector.broadcast %36 : vector<1x96xf32> to vector<16x96xf32>
    %42 = arith.addf %40, %41 : vector<16x96xf32>
    %c0_28 = arith.constant 0 : index
    %c0_29 = arith.constant 0 : index
    %c0_30 = arith.constant 0 : index
    %43 = vector.load %arg4[%c0_28, %c0_29, %c0_30] : memref<2x1x8xf32, #tpu.memory_space<vmem>>, vector<2x1x8xf32>
    %44 = vector.shape_cast %43 : vector<2x1x8xf32> to vector<2x1x8x1xf32>
    %45 = vector.shape_cast %39 : vector<16x64xf32> to vector<2x8x4x16xf32>
    %46 = tpu.transpose %45, [0, 2, 1, 3] : vector<2x8x4x16xf32> -> vector<2x4x8x16xf32>
    %47 = vector.broadcast %44 : vector<2x1x8x1xf32> to vector<2x4x8x16xf32>
    %48 = arith.mulf %46, %47 : vector<2x4x8x16xf32>
    %49 = vector.shape_cast %48 : vector<2x4x8x16xf32> to vector<8x8x16xf32>
    %50 = vector.shape_cast %42 : vector<16x96xf32> to vector<2x8x4x24xf32>
    %51 = tpu.transpose %50, [0, 2, 1, 3] : vector<2x8x4x24xf32> -> vector<2x4x8x24xf32>
    %52 = vector.shape_cast %51 : vector<2x4x8x24xf32> to vector<8x8x24xf32>
    %53 = vector.extract_strided_slice %49 {offsets = [0, 0, 0], sizes = [8, 8, 8], strides = [1, 1, 1]} : vector<8x8x16xf32> to vector<8x8x8xf32>
    %54 = vector.extract_strided_slice %49 {offsets = [0, 0, 8], sizes = [8, 8, 8], strides = [1, 1, 1]} : vector<8x8x16xf32> to vector<8x8x8xf32>
    %55 = vector.extract_strided_slice %52 {offsets = [0, 0, 0], sizes = [8, 8, 8], strides = [1, 1, 1]} : vector<8x8x24xf32> to vector<8x8x8xf32>
    %56 = vector.extract_strided_slice %52 {offsets = [0, 0, 8], sizes = [8, 8, 8], strides = [1, 1, 1]} : vector<8x8x24xf32> to vector<8x8x8xf32>
    %57 = vector.extract_strided_slice %52 {offsets = [0, 0, 16], sizes = [8, 8, 8], strides = [1, 1, 1]} : vector<8x8x24xf32> to vector<8x8x8xf32>
    "tpu.trace_start"() <{level = 10 : i32, message = "bid,bjd->bij"}> : () -> ()
    %cst_31 = arith.constant dense<0.000000e+00> : vector<8x8x8xf32>
    %58 = tpu.matmul %53, %54, %cst_31 {dimension_numbers = #tpu.dot_dimension_numbers<[2], [2], [1], [1], [0, 0, 0, 1, 1, 1], [0], [0]>} : vector<8x8x8xf32>, vector<8x8x8xf32>, vector<8x8x8xf32> -> vector<8x8x8xf32>
    "tpu.trace_stop"() : () -> ()
    %59 = vector.shape_cast %58 : vector<8x8x8xf32> to vector<2x4x8x8xf32>
    %cst_32 = arith.constant 0.000000e+00 : f32
    %60 = vector.broadcast %cst_32 : f32 to vector<2x4x8x8xf32>
    %61 = arith.maximumf %59, %60 : vector<2x4x8x8xf32>
    %62 = vector.broadcast %28 : vector<2x1x8x8xf32> to vector<2x4x8x8xf32>
    %63 = arith.addf %61, %62 : vector<2x4x8x8xf32>
    "tpu.trace_start"() <{level = 10 : i32, message = "bid,bjd->bij"}> : () -> ()
    %cst_33 = arith.constant dense<0.000000e+00> : vector<8x8x8xf32>
    %64 = tpu.matmul %55, %56, %cst_33 {dimension_numbers = #tpu.dot_dimension_numbers<[2], [2], [1], [1], [0, 0, 0, 1, 1, 1], [0], [0]>} : vector<8x8x8xf32>, vector<8x8x8xf32>, vector<8x8x8xf32> -> vector<8x8x8xf32>
    "tpu.trace_stop"() : () -> ()
    %65 = vector.shape_cast %64 : vector<8x8x8xf32> to vector<2x4x8x8xf32>
    %cst_34 = arith.constant 1.000000e+00 : f32
    %66 = vector.broadcast %cst_34 : f32 to vector<2x1x8xf32>
    %67 = arith.subf %43, %66 : vector<2x1x8xf32>
    %cst_35 = arith.constant 1.000000e+30 : f32
    %68 = vector.broadcast %cst_35 : f32 to vector<2x1x8xf32>
    %69 = arith.mulf %67, %68 : vector<2x1x8xf32>
    %70 = vector.shape_cast %69 : vector<2x1x8xf32> to vector<2x1x1x8xf32>
    %cst_36 = arith.constant 9.99999997E-7 : f32
    %71 = vector.broadcast %cst_36 : f32 to vector<2x4x8x8xf32>
    %72 = arith.maximumf %63, %71 : vector<2x4x8x8xf32>
    %73 = math.log %72 : vector<2x4x8x8xf32>
    %74 = arith.addf %73, %65 : vector<2x4x8x8xf32>
    %75 = vector.broadcast %70 : vector<2x1x1x8xf32> to vector<2x4x8x8xf32>
    %76 = arith.addf %74, %75 : vector<2x4x8x8xf32>
    %cst_37 = arith.constant dense<0xFF800000> : vector<2x4x8xf32>
    %77 = vector.multi_reduction <maximumf>, %76, %cst_37 [3] : vector<2x4x8x8xf32> to vector<2x4x8xf32>
    %78 = vector.shape_cast %77 : vector<2x4x8xf32> to vector<2x4x8x1xf32>
    %79 = vector.broadcast %78 : vector<2x4x8x1xf32> to vector<2x4x8x8xf32>
    %80 = arith.subf %76, %79 : vector<2x4x8x8xf32>
    %81 = math.exp %80 : vector<2x4x8x8xf32>
    %cst_38 = arith.constant dense<0.000000e+00> : vector<2x4x8xf32>
    %82 = vector.multi_reduction <add>, %81, %cst_38 [3] : vector<2x4x8x8xf32> to vector<2x4x8xf32>
    %83 = vector.shape_cast %82 : vector<2x4x8xf32> to vector<2x4x8x1xf32>
    %84 = tpu.reciprocal %83 : vector<2x4x8x1xf32> -> vector<2x4x8x1xf32>
    %85 = vector.broadcast %84 : vector<2x4x8x1xf32> to vector<2x4x8x8xf32>
    %86 = arith.mulf %81, %85 : vector<2x4x8x8xf32>
    %87 = vector.shape_cast %86 : vector<2x4x8x8xf32> to vector<8x8x8xf32>
    "tpu.trace_start"() <{level = 10 : i32, message = "bij,bjd->bid"}> : () -> ()
    %cst_39 = arith.constant dense<0.000000e+00> : vector<8x8x8xf32>
    %88 = tpu.matmul %87, %57, %cst_39 {dimension_numbers = #tpu.dot_dimension_numbers<[2], [1], [1], [2], [0, 0, 0, 1, 1, 2], [0], [0]>} : vector<8x8x8xf32>, vector<8x8x8xf32>, vector<8x8x8xf32> -> vector<8x8x8xf32>
    "tpu.trace_stop"() : () -> ()
    %89 = vector.shape_cast %88 : vector<8x8x8xf32> to vector<2x4x8x8xf32>
    %90 = tpu.transpose %89, [0, 2, 1, 3] : vector<2x4x8x8xf32> -> vector<2x8x4x8xf32>
    %91 = vector.shape_cast %90 : vector<2x8x4x8xf32> to vector<2x8x32xf32>
    %92 = arith.addf %91, %29 : vector<2x8x32xf32>
    %c0_40 = arith.constant 0 : index
    %c0_41 = arith.constant 0 : index
    %c0_42 = arith.constant 0 : index
    %93 = vector.load %arg8[%c0_40, %c0_41, %c0_42] : memref<2x8x32xf32, #tpu.memory_space<vmem>>, vector<2x8x32xf32>
    tpu.vector_store %arg8[%c0_40, %c0_41, %c0_42], %92 {strides = array<i32>} : memref<2x8x32xf32, #tpu.memory_space<vmem>>, vector<2x8x32xf32>,
    return
  }
}

</mosaic_0001>

<bundles_post_ra>
// kernel: tpu_custom_call.1
= control target key start
LH: loop header
LB: loop body
LE: loop exit
PB: predicated region body
PF: predicated region fallthrough
CT: control target
= control target key end

     0   :  { %14 = vsyncpa [#allocation4], 0  ;;  %s3081_s0 = inlined_call_operand.vmem [shape: f32[2,8,32], index: 0, kind: input, shape index: {}]   ;;  %s3082_s1 = inlined_call_operand.vmem [shape: f32[2,8,1], index: 1, kind: input, shape index: {}]   ;;  %s3083_s2 = inlined_call_operand.hbm [shape: f32[2,8,32], index: 2, kind: input, shape index: {}]   ;;  %s3084_s3 = inlined_call_operand.hbm [shape: f32[2,8,32], index: 3, kind: input, shape index: {}]   ;;  %s3085_s4 = inlined_call_operand.vmem [shape: f32[2,1,8], index: 4, kind: input, shape index: {}]   ;;  %s3086_s5 = inlined_call_operand.hbm [shape: f32[32,224], index: 5, kind: input, shape index: {}]   ;;  %s3087_s6 = inlined_call_operand.vmem [shape: f32[1,256], index: 6, kind: input, shape index: {}]   ;;  %s3088_s7 = inlined_call_operand.<no memory space> [shape: f32[1,1], index: 7, kind: input, shape index: {}]   ;;  %s3089_s8 = inlined_call_operand.hbm [shape: f32[2,8,32], index: 8, kind: output, shape index: {}]  }
   0x1   :  { %15 = vsyncpa [#allocation7], 0 }
   0x2   :  { %16 = vsyncpa [#allocation5], 0  ;;  %s38_s29 = sshll.u32 %s3084_s3, 4  ;;  %s2311_s30 = smov [#allocation6]   ;;  %s39_s29 = int_to_ptr.hbm [resolvable:$true] %s38_s29 }
   0x3   :  { %s40_s9 = sshll.u32 %s2311_s30, 4  ;;  %s25_s12 = sshll.u32 %s3083_s2, 4  ;;  %s41_s9 = int_to_ptr.vmem [resolvable:$true] %s40_s9  ;;  %s26_s12 = int_to_ptr.hbm [resolvable:$true] %s25_s12 }
   0x4   :  { %s2312_s13 = smov 128   ;;  %s2313_s14 = smov 8  }
   0x5   :  { %46 = dma.hbm_to_vmem [thread:$0]  %s39_s29, 256, %s41_s9, [#allocation7], %s2312_s13, %s2312_s13, %s2313_s14  }
   0x6   :  { %s2314_s15 = smov [#allocation3]   ;;  %s53_s3 = sshll.u32 %s3086_s5, 4  ;;  %s54_s3 = int_to_ptr.hbm [resolvable:$true] %s53_s3 }
   0x7   :  { %s27_s16 = sshll.u32 %s2314_s15, 4  ;;  %s2315_s2 = smov [#allocation8]   ;;  %s28_s16 = int_to_ptr.vmem [resolvable:$true] %s27_s16 }
   0x8   :  { %33 = dma.hbm_to_vmem [thread:$0]  %s26_s12, 256, %s28_s16, [#allocation4], %s2312_s13, %s2312_s13, %s2313_s14  }
   0x9   :  { %s55_s19 = sshll.u32 %s2315_s2, 4  ;;  %s2316_s20 = smov 256   ;;  %s56_s19 = int_to_ptr.vmem [resolvable:$true] %s55_s19 }
   0xa   :  { %s2317_s21 = smov 16  }
   0xb   :  { %61 = dma.hbm_to_vmem [thread:$0]  %s54_s3, 1024, %s56_s19, [#allocation7], %s2316_s20, %s2316_s20, %s2317_s21  }
   0xc   :  { %2305 = dma.done.wait [#allocation4], 256  }
   0xd   :  { %2306 = vsyncadd [#allocation4], 4294967040 }
   0xe   :  { %2307 = dma.done.wait [#allocation7], 1280  }
   0xf   :  { %2308 = vsyncadd [#allocation7], 4294966016  ;;  %v2318_v0 = vmov 0   ;;  %v80_v1 = vld [vmem:[%s3082_s1] sm:$0xff]  ;;  %v269_v3 = vld [vmem:[#allocation8 + $0x30] sm:$0xff]  ;;  %s2319_s23 = smov 64   ;;  %v108_v38 = vstv %s3088_s7  ;;  %v367_v42 = vlaneseq }
  0x10   :  { %2124 = vset.pattern.permute.xlu1 %v2318_v0  ;;  %v268_v2 = vld [vmem:[#allocation8 + $0x20] sm:$0xff]  ;;  %190 = vmatpush.msra.mxu0 %v269_v3  ;;  %v267_v6 = vld [vmem:[#allocation8 + $0x10] sm:$0xff]  ;;  %v81_v7 = vld [vmem:[%s3082_s1 + $0x8] sm:$0xff]  ;;  %vm100_vm0 = vcmask 261120   ;;  %s2320_s1 = smov 32   ;;  %s2321_s16 = smov 96  }
  0x11   :  { %84 = vperm.xlu1 %2124, %v80_v1   ;;  %v2114_v4 = vpack.i.bf16 %v268_v2, %v269_v3  ;;  %v266_v5 = vld [vmem:[#allocation8] sm:$0xff]  ;;  %v274_v9 = vld [vmem:[#allocation8 + $0x38] sm:$0xff]  ;;  %v273_v10 = vld [vmem:[#allocation8 + $0x28] sm:$0xff]  ;;  %v368_v43 = vshrl.u32 %v367_v42, 7  ;;  %s2322_s7 = smov 112   ;;  %s2323_s17 = smov 80  }
  0x12   :  { %191 = vmatpush.msra.mxu0 %v268_v2  ;;  %v2119_v8 = vpack.i.bf16 %v266_v5, %v267_v6  ;;  %353 = vmatpush.msra.mxu2 %v274_v9  ;;  %v272_v11 = vld [vmem:[#allocation8 + $0x18] sm:$0xff]  ;;  %v271_v12 = vld [vmem:[#allocation8 + $0x8] sm:$0xff]  ;;  %v262_v13 = vld [vmem:[#allocation3] sm:$0xff]  ;;  %s2324_s18 = smov 56   ;;  %vm171_vm9 = vcmask 1041409   ;;  %s2325_s19 = smov 104  }
  0x13   :  { %2115 = vrot.lane.b32.xlu0 %v2114_v4, %s2319_s23  ;;  %v263_v14 = vld [vmem:[#allocation3 + $0x8] sm:$0xff]  ;;  %v270_v15 = vld [vmem:[%s3087_s6] sm:$0x3]  ;;  %v264_v36 = vld [vmem:[#allocation6] sm:$0xff]  ;;  %2125 = vset.pattern.permute.xlu2 %v368_v43  ;;  %vm222_vm10 = vcmask 1047556   ;;  %s2328_s22 = smov 120  }
  0x14   :  { %192 = vmatpush.msra.mxu0 %v267_v6  ;;  %354 = vmatpush.msra.mxu2 %v273_v10  ;;  %v277_v16 = vperm.slane %v270_v15, 0  ;;  %v78_v17 = vld [vmem:[%s3081_s0] sm:$0xff]  ;;  %v278_v19 = vperm.slane %v270_v15, 1  ;;  %v79_v27 = vld [vmem:[%s3081_s0 + $0x8] sm:$0xff]  ;;  %v265_v37 = vld [vmem:[#allocation6 + $0x8] sm:$0xff]  ;;  %vm871_vm11 = vcmask 64512  }
  0x15   :  { %v2411_v18 = vld [vmem:[%s3087_s6] ss:$0 sm:$0xff]  ;;  %v2148_v28 = vld [vmem:[%s3087_s6 + $0x1] ss:$0 sm:$0xff]  ;;  %2146 = vset.pattern.permute.xlu0 %v368_v43  ;;  %s2330_s24 = smov 72   ;;  %s2029_s9 = sshll.u32 %s3089_s8, 4  ;;  %s2030_s9 = int_to_ptr.hbm [resolvable:$true] %s2029_s9 }
  0x16   :  { %193 = vmatpush.msra.mxu0 %v266_v5  ;;  %355 = vmatpush.msra.mxu2 %v272_v11 }
  0x17   :  { %295 = vrot.lane.b32.xlu2 %v277_v16, %s2320_s1 }
  0x18   :  { %356 = vmatpush.msra.mxu2 %v271_v12 }
  0x19   :  { %89 = vperm.xlu1 %2124, %v81_v7   ;;  %2048 = vmatmul.msk.f32.vlgmr.msra.gmra.mxu2 %vm100_vm0, %v262_v13 }
  0x1b   :  { %2120 = vrot.lane.b32.xlu0 %v2119_v8, %s2319_s23  ;;  %s2329_s23 = smov 88  }
  0x1f   :  { %297 = vrot.lane.b32.xlu2 %v278_v19, %s2320_s1 }
  0x21   :  { %2049 = vmatmul.msk.f32.gmra.mxu2 %vm100_vm0, %v263_v14 }
  0x27   :  { %332 = vrot.lane.b32.xlu2 %v2148_v28, %s2321_s16  ;;  %v2149_v28 = vld [vmem:[%s3085_s4] ss:$0 sm:$0xff] }
  0x71   :  { %v296_v44 = vpop.permute.xlu2 %295 }
  0x79   :  { %v298_v50 = vpop.permute.xlu2 %297 }
  0x7a   :  { %v299_v54 = vsel %vm100_vm0, %v296_v44, %v298_v50 }
  0x81   :  { %v333_v11 = vpop.permute.xlu2 %332 }
  0x83   :  { %v85_v20 = vpop.permute.xlu1 %84 }
  0x84   :  { %v2413_v21 = vmul.f32 %v85_v20, %v78_v17 }
  0x85   :  { %v2116_v22 = vpop.permute.xlu0 %2115 }
  0x86   :  { %v2117_v23 = vunpack.i.l.bf16 %v2116_v22  ;;  %v98_v24 = vmul.f32 %v2411_v18, %v2413_v21  ;;  %v2118_v26 = vunpack.i.h.bf16 %v2116_v22 }
  0x88   :  { %319 = vmatpush.msra.mxu1 %v2117_v23  ;;  %v101_v25 = vsel %vm100_vm0, %v98_v24, 0.0 }
  0x89   :  { %102 = vadd.xlane.f32.xlu0 %v101_v25 }
  0x8a   :  { %320 = vmatpush.msra.mxu1 %v2118_v26 }
  0x8b   :  { %v90_v29 = vpop.permute.xlu1 %89 }
  0x8c   :  { %v2424_v30 = vmul.f32 %v90_v29, %v79_v27 }
  0x8d   :  { %v2121_v31 = vpop.permute.xlu0 %2120 }
  0x8e   :  { %v2122_v32 = vunpack.i.l.bf16 %v2121_v31  ;;  %v99_v33 = vmul.f32 %v2411_v18, %v2424_v30  ;;  %v2123_v35 = vunpack.i.h.bf16 %v2121_v31 }
  0x90   :  { %321 = vmatpush.msra.mxu1 %v2122_v32  ;;  %v104_v34 = vsel %vm100_vm0, %v99_v33, 0.0 }
  0x91   :  { %105 = vadd.xlane.f32.xlu1 %v104_v34 }
  0x92   :  { %322 = vmatpush.msra.mxu1 %v2123_v35 }
  0x93   :  { %2046 = vmatmul.msk.f32.vlgmr.msra.gmra.mxu1 %vm100_vm0, %v264_v36 }
  0x9b   :  { %2047 = vmatmul.msk.f32.gmra.mxu1 %vm100_vm0, %v265_v37 }
  0x9c   :  { %v358_v59 = vpop.f32.mrf.mxu2 }
  0x9d   :  { %v2453_v20 = vadd.f32 %v358_v59, %v333_v11 }
  0xa4   :  { %v361_v12 = vpop.f32.mrf.mxu2 }
  0xa5   :  { %v2451_v19 = vadd.f32 %v361_v12, %v333_v11 }
  0xfc   :  { %v103_v39 = vpop.xlane.xlu0 %102 }
  0xfd   :  { %v109_v40 = vadd.f32 %v108_v38, %v103_v39 }
  0xff   :  { %v2043_v41 = vmul.f32 -1.442695, %v109_v40  ;;  %v2326_v40 = vmov 1983009808  }
 0x101   :  { %2151 = vpow2.f32 %v2043_v41  ;;  %v225_v41 = vunpack.c.l.s4 %v2326_v40 }
 0x104   :  { %v106_v45 = vpop.xlane.xlu1 %105 }
 0x105   :  { %v110_v46 = vadd.f32 %v108_v38, %v106_v45  ;;  %v2150_v38 = vld [vmem:[%s3085_s4 + $0x1] ss:$0 sm:$0xff]  ;;  %v2479_v45 = vunpack.c.0.s8 %v225_v41 }
 0x107   :  { %v2152_v47 = vpop.eup %2151  ;;  %v2044_v48 = vmul.f32 -1.442695, %v110_v46 }
 0x108   :  { %v117_v49 = vadd.f32 1.0, %v2152_v47 }
 0x109   :  { %2153 = vpow2.f32 %v2044_v48  ;;  %v2327_v48 = vmov 1934713408  }
 0x10a   :  { %2155 = vrcp.f32 %v117_v49  ;;  %v130_v58 = vand.u32 2147483648, %v117_v49  ;;  %vm124_vm1 = vweird.f32 %v117_v49  ;;  %v128_v61 = vand.u32 2147483647, %v117_v49 }
 0x10c   :  { %v131_v63 = vor.u32 1.1754944e-38, %v130_v58  ;;  %vm129_vm4 = vcmp.eq.f32.partialorder %v128_v61, 8.507059e+37 }
 0x10f   :  { %v2154_v51 = vpop.eup %2153 }
 0x110   :  { %v2156_v52 = vpop.eup %2155  ;;  %v118_v53 = vadd.f32 1.0, %v2154_v51  ;;  %v324_v55 = vpop.f32.mrf.mxu1 }
 0x111   :  { %v120_v56 = vmul.f32 %v2156_v52, %v117_v49  ;;  %v2436_v57 = vadd.f32 %v324_v55, %v299_v54  ;;  %vm125_vm2 = vweird.f32 %v2156_v52  ;;  %v249_v49 = vunpack.c.l.s4 %v2327_v48 }
 0x112   :  { %2157 = vrcp.f32 %v118_v53  ;;  %vm126_vm3 = vmor %vm124_vm1, %vm125_vm2  ;;  %vm139_vm5 = vweird.f32 %v118_v53  ;;  %v145_v6 = vand.u32 2147483648, %v118_v53  ;;  %v143_v9 = vand.u32 2147483647, %v118_v53 }
 0x113   :  { %v121_v60 = vsub.f32 1.0, %v120_v56  ;;  %382 = vrot.lane.b32.xlu2 %v2436_v57, %s2322_s7  ;;  %v402_v44 = vrot.slane %v2436_v57, 4 }
 0x114   :  { %v146_v15 = vor.u32 1.1754944e-38, %v145_v6  ;;  %vm144_vm8 = vcmp.eq.f32.partialorder %v143_v9, 8.507059e+37 }
 0x115   :  { %v122_v62 = vmul.f32 %v2156_v52, %v121_v60 }
 0x117   :  { %v123_v0 = vadd.f32 %v2156_v52, %v122_v62 }
 0x118   :  { %v2158_v1 = vpop.eup %2157  ;;  %v327_v2 = vpop.f32.mrf.mxu1 }
 0x119   :  { %v135_v3 = vmul.f32 %v2158_v1, %v118_v53  ;;  %v2440_v4 = vadd.f32 %v327_v2, %v299_v54  ;;  %v127_v5 = vsel %vm126_vm3, %v2156_v52, %v123_v0  ;;  %vm140_vm6 = vweird.f32 %v2158_v1 }
 0x11a   :  { %v132_v7 = vsel %vm129_vm4, %v131_v63, %v127_v5  ;;  %vm141_vm7 = vmor %vm139_vm5, %vm140_vm6  ;;  %v2486_v54 = vunpack.c.0.s8 %v249_v49 }
 0x11b   :  { %v136_v8 = vsub.f32 1.0, %v135_v3  ;;  %388 = vrot.lane.b32.xlu2 %v2436_v57, %s2321_s16  ;;  %396 = vrot.lane.b32.xlu1 %v2440_v4, %s2323_s17  ;;  %v149_v10 = vmul.f32 %v132_v7, %v2413_v21 }
 0x11c   :  { %390 = vrot.lane.b32.xlu0 %v2440_v4, %s2321_s16 }
 0x11d   :  { %v137_v13 = vmul.f32 %v2158_v1, %v136_v8  ;;  %v151_v14 = vsel %vm100_vm0, %v149_v10, 0.0 }
 0x11e   :  { %v152_v16 = vrot.slane %v151_v14, 4 }
 0x11f   :  { %v138_v17 = vadd.f32 %v2158_v1, %v137_v13 }
 0x120   :  { %v153_v22 = vadd.f32 %v152_v16, %v151_v14 }
 0x121   :  { %v142_v21 = vsel %vm141_vm7, %v2158_v1, %v138_v17 }
 0x122   :  { %v147_v23 = vsel %vm144_vm8, %v146_v15, %v142_v21  ;;  %v154_v25 = vrot.slane %v153_v22, 2 }
 0x123   :  { %394 = vrot.lane.b32.xlu2 %v2436_v57, %s2323_s17  ;;  %638 = vrot.lane.b32.xlu1 %v2451_v19, %s2323_s17  ;;  %v150_v24 = vmul.f32 %v147_v23, %v2424_v30 }
 0x124   :  { %642 = vrot.lane.b32.xlu0 %v2453_v20, %s2324_s18  ;;  %v155_v29 = vadd.f32 %v154_v25, %v153_v22 }
 0x125   :  { %v158_v26 = vsel %vm100_vm0, %v150_v24, 0.0 }
 0x126   :  { %v159_v27 = vrot.slane %v158_v26, 4  ;;  %v156_v33 = vrot.slane %v155_v29, 1 }
 0x128   :  { %v160_v31 = vadd.f32 %v159_v27, %v158_v26  ;;  %v157_v35 = vadd.f32 %v156_v33, %v155_v29 }
 0x12a   :  { %v161_v32 = vrot.slane %v160_v31, 2 }
 0x12b   :  { %371 = vperm.xlu2 %2125, %v2149_v28  }
 0x12c   :  { %644 = vrot.lane.b32.xlu0 %v2451_v19, %s2324_s18  ;;  %v162_v34 = vadd.f32 %v161_v32, %v160_v31 }
 0x12e   :  { %v163_v30 = vrot.slane %v162_v34, 1 }
 0x130   :  { %v164_v36 = vadd.f32 %v163_v30, %v162_v34 }
 0x132   :  { %v172_v37 = vsel %vm171_vm9, %v164_v36, %v157_v35  ;;  %v458_v36 = vrot.slane %v2440_v4, 4 }
 0x133   :  { %384 = vrot.lane.b32.xlu2 %v2440_v4, %s2322_s7  ;;  %2045 = vmatmul.msk.f32.vlgmr.msra.gmra.mxu0 %vm100_vm0, %v172_v37  ;;  %v706_v37 = vrot.slane %v2451_v19, 4 }
 0x13b   :  { %630 = vrot.lane.b32.xlu2 %v2453_v20, %s2325_s19 }
 0x143   :  { %636 = vrot.lane.b32.xlu2 %v2453_v20, %s2323_s17 }
 0x14b   :  { %632 = vrot.lane.b32.xlu2 %v2451_v19, %s2325_s19 }
 0x153   :  { %378 = vperm.xlu2 %2125, %v2150_v38  }
 0x16d   :  { %v383_v39 = vpop.permute.xlu2 %382 }
 0x16e   :  { %v414_v51 = vrot.slane %v383_v39, 4 }
 0x175   :  { %v389_v42 = vpop.permute.xlu2 %388 }
 0x176   :  { %v400_v43 = vrot.slane %v389_v42, 4  ;;  %v403_v46 = vsel %vm222_vm10, %v389_v42, %v402_v44 }
 0x177   :  { %v411_v50 = vperm.slane %v403_v46, %v2479_v45 }
 0x178   :  { %v401_v47 = vsel %vm222_vm10, %v400_v43, %v2436_v57 }
 0x179   :  { %v407_v52 = vperm.slane %v401_v47, %v2479_v45  ;;  %v438_v58 = vrot.slane %v411_v50, 4 }
 0x17b   :  { %v426_v61 = vrot.slane %v407_v52, 4 }
 0x17d   :  { %v395_v53 = vpop.permute.xlu2 %394 }
 0x17e   :  { %v412_v55 = vrot.slane %v395_v53, 4  ;;  %v415_v56 = vsel %vm222_vm10, %v395_v53, %v414_v51 }
 0x17f   :  { %v423_v59 = vperm.slane %v415_v56, %v2479_v45 }
 0x180   :  { %v413_v60 = vsel %vm222_vm10, %v412_v55, %v383_v39 }
 0x181   :  { %v419_v57 = vperm.slane %v413_v60, %v2479_v45  ;;  %v436_v62 = vrot.slane %v423_v59, 4  ;;  %v439_v63 = vsel %vm222_vm10, %v423_v59, %v438_v58 }
 0x182   :  { %v447_v0 = vperm.slane %v439_v63, %v2486_v54 }
 0x183   :  { %v424_v1 = vrot.slane %v419_v57, 4  ;;  %v427_v2 = vsel %vm222_vm10, %v419_v57, %v426_v61  ;;  %v437_v3 = vsel %vm222_vm10, %v436_v62, %v411_v50 }
 0x184   :  { %v435_v5 = vperm.slane %v427_v2, %v2486_v54  ;;  %v443_v6 = vperm.slane %v437_v3, %v2486_v54  ;;  %v454_v7 = vrot.slane %v447_v0, 4 }
 0x185   :  { %v425_v8 = vsel %vm222_vm10, %v424_v1, %v407_v52  ;;  %v2499_v9 = vpop.permute.xlu2 %371  ;;  %v650_v1 = vrot.slane %v2453_v20, 4 }
 0x186   :  { %v431_v10 = vperm.slane %v425_v8, %v2486_v54  ;;  %v450_v11 = vrot.slane %v435_v5, 4  ;;  %v452_v12 = vrot.slane %v443_v6, 4  ;;  %v455_v13 = vsel %vm222_vm10, 0.0, %v454_v7 }
 0x187   :  { %v523_v14 = vsel %vm222_vm10, %v454_v7, %v443_v6  ;;  %v528_v15 = vrot.slane %v455_v13, 4 }
 0x188   :  { %v448_v16 = vrot.slane %v431_v10, 4  ;;  %v451_v17 = vsel %vm222_vm10, 0.0, %v450_v11  ;;  %v453_v22 = vsel %vm222_vm10, 0.0, %v452_v12  ;;  %v512_v21 = vsel %vm222_vm10, %v450_v11, %v431_v10 }
 0x189   :  { %v516_v23 = vperm.slane %v512_v21, %v2479_v45  ;;  %v517_v24 = vrot.slane %v451_v17, 4  ;;  %v527_v25 = vperm.slane %v523_v14, %v2479_v45  ;;  %v529_v26 = vsel %vm222_vm10, %v528_v15, %v453_v22 }
 0x18a   :  { %v449_v27 = vsel %vm222_vm10, 0.0, %v448_v16  ;;  %v533_v28 = vperm.slane %v529_v26, %v2479_v45 }
 0x18b   :  { %v518_v29 = vsel %vm222_vm10, %v517_v24, %v449_v27  ;;  %v536_v31 = vrot.slane %v516_v23, 4  ;;  %v548_v32 = vrot.slane %v527_v25, 4 }
 0x18c   :  { %v522_v33 = vperm.slane %v518_v29, %v2479_v45  ;;  %v546_v34 = vrot.slane %v533_v28, 4 }
 0x18d   :  { %v385_v30 = vpop.permute.xlu2 %384  ;;  %v397_v35 = vpop.permute.xlu1 %396  ;;  %v549_v38 = vsel %vm222_vm10, %v533_v28, %v548_v32 }
 0x18e   :  { %v470_v39 = vrot.slane %v385_v30, 4  ;;  %v468_v40 = vrot.slane %v397_v35, 4  ;;  %v391_v41 = vpop.permute.xlu0 %390  ;;  %v537_v42 = vsel %vm222_vm10, %v522_v33, %v536_v31  ;;  %v2519_v43 = vperm.slane %v549_v38, %v2486_v54 }
 0x18f   :  { %v456_v44 = vrot.slane %v391_v41, 4  ;;  %v459_v46 = vsel %vm222_vm10, %v391_v41, %v458_v36  ;;  %v2523_v47 = vperm.slane %v537_v42, %v2486_v54  ;;  %v534_v48 = vrot.slane %v522_v33, 4 }
 0x190   :  { %v469_v49 = vsel %vm222_vm10, %v468_v40, %v385_v30  ;;  %v471_v50 = vsel %vm222_vm10, %v397_v35, %v470_v39  ;;  %v467_v51 = vperm.slane %v459_v46, %v2479_v45  ;;  %v547_v52 = vsel %vm222_vm10, %v546_v34, %v527_v25 }
 0x191   :  { %v475_v53 = vperm.slane %v469_v49, %v2479_v45  ;;  %v479_v55 = vperm.slane %v471_v50, %v2479_v45  ;;  %v457_v56 = vsel %vm222_vm10, %v456_v44, %v2440_v4  ;;  %v564_v58 = vrot.slane %v2523_v47, 4 }
 0x192   :  { %v463_v59 = vperm.slane %v457_v56, %v2479_v45  ;;  %v494_v60 = vrot.slane %v467_v51, 4  ;;  %v535_v61 = vsel %vm222_vm10, %v534_v48, %v516_v23  ;;  %v553_v57 = vperm.slane %v547_v52, %v2486_v54 }
 0x193   :  { %v480_v62 = vrot.slane %v475_v53, 4  ;;  %v492_v63 = vrot.slane %v479_v55, 4  ;;  %v565_v0 = vsel %vm222_vm10, %v2519_v43, %v564_v58  ;;  %v541_v5 = vperm.slane %v535_v61, %v2486_v54 }
 0x194   :  { %v482_v2 = vrot.slane %v463_v59, 4  ;;  %v495_v3 = vsel %vm222_vm10, %v479_v55, %v494_v60  ;;  %v2542_v4 = vmul.f32 %v565_v0, %v2499_v9  ;;  %v558_v12 = vrot.slane %v553_v57, 4 }
 0x195   :  { %v481_v6 = vsel %vm222_vm10, %v480_v62, %v463_v59  ;;  %v493_v7 = vsel %vm222_vm10, %v492_v63, %v467_v51  ;;  %v503_v8 = vperm.slane %v495_v3, %v2486_v54  ;;  %v631_v10 = vpop.permute.xlu2 %630  ;;  %v639_v11 = vpop.permute.xlu1 %638  ;;  %v560_v36 = vrot.slane %v541_v5, 4 }
 0x196   :  { %v483_v13 = vsel %vm222_vm10, %v475_v53, %v482_v2  ;;  %v487_v14 = vperm.slane %v481_v6, %v2486_v54  ;;  %v499_v15 = vperm.slane %v493_v7, %v2486_v54  ;;  %v662_v16 = vrot.slane %v631_v10, 4  ;;  %v643_v17 = vpop.permute.xlu0 %642  ;;  %951 = vrot.lane.b32.xlu2 %v2542_v4, %s2328_s22 }
 0x197   :  { %v491_v22 = vperm.slane %v483_v13, %v2486_v54  ;;  %v510_v21 = vrot.slane %v503_v8, 4  ;;  %v704_v23 = vrot.slane %v639_v11, 4  ;;  %v707_v24 = vsel %vm222_vm10, %v639_v11, %v706_v37 }
 0x198   :  { %v504_v25 = vrot.slane %v487_v14, 4  ;;  %v508_v26 = vrot.slane %v499_v15, 4  ;;  %v2556_v27 = vperm.slane %v707_v24, %v2479_v45  ;;  %v660_v28 = vrot.slane %v643_v17, 4 }
 0x199   :  { %v506_v29 = vrot.slane %v491_v22, 4  ;;  %v511_v31 = vsel %vm222_vm10, 0.0, %v510_v21  ;;  %v577_v32 = vsel %vm222_vm10, %v510_v21, %v499_v15  ;;  %v705_v33 = vsel %vm222_vm10, %v704_v23, %v2451_v19 }
 0x19a   :  { %v505_v34 = vsel %vm222_vm10, 0.0, %v504_v25  ;;  %v509_v30 = vsel %vm222_vm10, 0.0, %v508_v26  ;;  %v582_v35 = vrot.slane %v511_v31, 4  ;;  %v2567_v39 = vperm.slane %v577_v32, %v2479_v45 }
 0x19b   :  { %v507_v37 = vsel %vm222_vm10, 0.0, %v506_v29  ;;  %v566_v38 = vsel %vm222_vm10, %v506_v29, %v487_v14  ;;  %v2570_v40 = vperm.slane %v705_v33, %v2479_v45  ;;  %v742_v42 = vrot.slane %v2556_v27, 4 }
 0x19c   :  { %v2573_v41 = vperm.slane %v566_v38, %v2479_v45  ;;  %v571_v19 = vrot.slane %v507_v37, 4  ;;  %v661_v44 = vsel %vm222_vm10, %v660_v28, %v631_v10  ;;  %v583_v46 = vsel %vm222_vm10, %v582_v35, %v509_v30 }
 0x19d   :  { %v663_v48 = vsel %vm222_vm10, %v643_v17, %v662_v16  ;;  %v667_v49 = vperm.slane %v661_v44, %v2479_v45  ;;  %v559_v50 = vsel %vm222_vm10, %v558_v12, %v541_v5  ;;  %v637_v51 = vpop.permute.xlu2 %636  ;;  %v561_v55 = vsel %vm222_vm10, %v553_v57, %v560_v36 }
 0x19e   :  { %v671_v52 = vperm.slane %v663_v48, %v2479_v45  ;;  %v2583_v53 = vmul.f32 %v559_v50, %v2499_v9  ;;  %v648_v56 = vrot.slane %v637_v51, 4  ;;  %v645_v58 = vpop.permute.xlu0 %644  ;;  %v730_v59 = vrot.slane %v2570_v40, 4 }
 0x19f   :  { %v2588_v60 = vmul.f32 %v561_v55, %v2499_v9  ;;  %v651_v61 = vsel %vm222_vm10, %v637_v51, %v650_v1  ;;  %v562_v62 = vrot.slane %v2519_v43, 4  ;;  %v672_v63 = vrot.slane %v667_v49, 4 }
 0x1a0   :  { %v684_v0 = vrot.slane %v671_v52, 4  ;;  %869 = vrot.lane.b32.xlu1 %v2583_v53, %s2328_s22  ;;  %v649_v2 = vsel %vm222_vm10, %v648_v56, %v2453_v20  ;;  %v659_v57 = vperm.slane %v651_v61, %v2479_v45  ;;  %v716_v5 = vrot.slane %v645_v58, 4 }
 0x1a1   :  { %897 = vrot.lane.b32.xlu0 %v2588_v60, %s2328_s22  ;;  %v655_v3 = vperm.slane %v649_v2, %v2479_v45  ;;  %v563_v1 = vsel %vm222_vm10, %v562_v62, %v2523_v47  ;;  %v572_v43 = vsel %vm222_vm10, %v571_v19, %v505_v34  ;;  %v2608_v20 = vperm.slane %v583_v46, %v2479_v45 }
 0x1a2   :  { %v685_v6 = vsel %vm222_vm10, %v684_v0, %v659_v57  ;;  %v686_v7 = vrot.slane %v659_v57, 4  ;;  %v2605_v8 = vperm.slane %v572_v43, %v2479_v45  ;;  %v590_v13 = vrot.slane %v2573_v41, 4 }
 0x1a3   :  { %v673_v10 = vsel %vm222_vm10, %v672_v63, %v655_v3  ;;  %v674_v11 = vrot.slane %v655_v3, 4  ;;  %v691_v12 = vperm.slane %v685_v6, %v2486_v54  ;;  %v2616_v15 = vmul.f32 %v563_v1, %v2499_v9 }
 0x1a4   :  { %v679_v47 = vperm.slane %v673_v10, %v2486_v54  ;;  %v687_v14 = vsel %vm222_vm10, %v671_v52, %v686_v7  ;;  %v602_v16 = vrot.slane %v2567_v39, 4  ;;  %v591_v24 = vsel %vm222_vm10, %v2605_v8, %v590_v13 }
 0x1a5   :  { %v675_v17 = vsel %vm222_vm10, %v667_v49, %v674_v11  ;;  %v695_v22 = vperm.slane %v687_v14, %v2486_v54  ;;  %v700_v21 = vrot.slane %v691_v12, 4  ;;  %v633_v23 = vpop.permute.xlu2 %632  ;;  %v588_v33 = vrot.slane %v2605_v8, 4 }
 0x1a6   :  { %v683_v25 = vperm.slane %v675_v17, %v2486_v54  ;;  %v696_v26 = vrot.slane %v679_v47, 4  ;;  %v717_v28 = vsel %vm222_vm10, %v716_v5, %v633_v23  ;;  %v718_v29 = vrot.slane %v633_v23, 4 }
 0x1a7   :  { %v701_v9 = vsel %vm222_vm10, 0.0, %v700_v21  ;;  %v702_v31 = vrot.slane %v695_v22, 4  ;;  %v723_v32 = vperm.slane %v717_v28, %v2479_v45  ;;  %v599_v35 = vperm.slane %v591_v24, %v2486_v54 }
 0x1a8   :  { %v698_v34 = vrot.slane %v683_v25, 4  ;;  %924 = vrot.lane.b32.xlu1 %v2616_v15, %s2328_s22  ;;  %v719_v30 = vsel %vm222_vm10, %v645_v58, %v718_v29  ;;  %v603_v36 = vsel %vm222_vm10, %v2608_v20, %v602_v16  ;;  %v697_v50 = vsel %vm222_vm10, 0.0, %v696_v26 }
 0x1a9   :  { %v703_v37 = vsel %vm222_vm10, 0.0, %v702_v31  ;;  %v771_v38 = vsel %vm222_vm10, %v702_v31, %v691_v12  ;;  %v727_v19 = vperm.slane %v719_v30, %v2479_v45  ;;  %v728_v44 = vrot.slane %v723_v32, 4 }
 0x1aa   :  { %v699_v46 = vsel %vm222_vm10, 0.0, %v698_v34  ;;  %v776_v48 = vrot.slane %v703_v37, 4  ;;  %v731_v49 = vsel %vm222_vm10, %v723_v32, %v730_v59  ;;  %v2647_v58 = vperm.slane %v771_v38, %v2479_v45 }
 0x1ab   :  { %v729_v51 = vsel %vm222_vm10, %v728_v44, %v2570_v40  ;;  %v739_v52 = vperm.slane %v731_v49, %v2486_v54  ;;  %v740_v55 = vrot.slane %v727_v19, 4  ;;  %v743_v56 = vsel %vm222_vm10, %v727_v19, %v742_v42 }
 0x1ac   :  { %v735_v61 = vperm.slane %v729_v51, %v2486_v54  ;;  %v751_v62 = vperm.slane %v743_v56, %v2486_v54  ;;  %v611_v59 = vperm.slane %v603_v36, %v2486_v54  ;;  %v618_v0 = vrot.slane %v599_v35, 4 }
 0x1ad   :  { %v741_v63 = vsel %vm222_vm10, %v740_v55, %v2556_v27  ;;  %v754_v40 = vrot.slane %v739_v52, 4  ;;  %v760_v2 = vsel %vm222_vm10, %v698_v34, %v679_v47  ;;  %v2656_v1 = vpop.permute.xlu2 %378  ;;  %v777_v43 = vsel %vm222_vm10, %v776_v48, %v701_v9 }
 0x1ae   :  { %v747_v57 = vperm.slane %v741_v63, %v2486_v54  ;;  %v752_v3 = vrot.slane %v735_v61, 4  ;;  %v758_v42 = vrot.slane %v751_v62, 4  ;;  %v616_v5 = vrot.slane %v611_v59, 4 }
 0x1af   :  { %v755_v6 = vsel %vm222_vm10, 0.0, %v754_v40  ;;  %v814_v7 = vsel %vm222_vm10, %v754_v40, %v735_v61  ;;  %v764_v8 = vperm.slane %v760_v2, %v2479_v45  ;;  %v619_v12 = vsel %vm222_vm10, %v611_v59, %v618_v0 }
 0x1b0   :  { %v753_v27 = vsel %vm222_vm10, 0.0, %v752_v3  ;;  %v756_v10 = vrot.slane %v747_v57, 4  ;;  %v759_v11 = vsel %vm222_vm10, 0.0, %v758_v42  ;;  %v2666_v13 = vperm.slane %v814_v7, %v2479_v45 }
 0x1b1   :  { %v819_v47 = vrot.slane %v755_v6, 4  ;;  %v2669_v14 = vmul.f32 %v619_v12, %v2656_v1  ;;  %v617_v16 = vsel %vm222_vm10, %v616_v5, %v599_v35  ;;  %v830_v17 = vrot.slane %v759_v11, 4 }
 0x1b2   :  { %v2673_v22 = vmul.f32 %v617_v16, %v2656_v1  ;;  %v765_v21 = vrot.slane %v699_v46, 4  ;;  %v781_v23 = vperm.slane %v777_v43, %v2479_v45  ;;  %v784_v24 = vrot.slane %v764_v8, 4 }
 0x1b3   :  { %1059 = vrot.lane.b32.xlu2 %v2669_v14, %s2328_s22  ;;  %v796_v25 = vrot.slane %v2647_v58, 4  ;;  %v589_v26 = vsel %vm222_vm10, %v588_v33, %v2573_v41  ;;  %v600_v28 = vrot.slane %v2608_v20, 4  ;;  %v757_v9 = vsel %vm222_vm10, 0.0, %v756_v10 }
 0x1b4   :  { %1032 = vrot.lane.b32.xlu0 %v2673_v22, %s2328_s22  ;;  %v766_v29 = vsel %vm222_vm10, %v765_v21, %v697_v50  ;;  %v820_v31 = vsel %vm222_vm10, %v819_v47, %v753_v27  ;;  %v825_v32 = vsel %vm222_vm10, %v758_v42, %v747_v57  ;;  %v595_v35 = vperm.slane %v589_v26, %v2486_v54 }
 0x1b5   :  { %v770_v34 = vperm.slane %v766_v29, %v2479_v45  ;;  %v797_v30 = vsel %vm222_vm10, %v781_v23, %v796_v25  ;;  %v601_v41 = vsel %vm222_vm10, %v600_v28, %v2567_v39  ;;  %v824_v20 = vperm.slane %v820_v31, %v2479_v45 }
 0x1b6   :  { %v805_v33 = vperm.slane %v797_v30, %v2486_v54  ;;  %v607_v36 = vperm.slane %v601_v41, %v2486_v54  ;;  %v829_v37 = vperm.slane %v825_v32, %v2479_v45  ;;  %v831_v19 = vsel %vm222_vm10, %v830_v17, %v757_v9 }
 0x1b7   :  { %v785_v38 = vsel %vm222_vm10, %v770_v34, %v784_v24  ;;  %v838_v44 = vrot.slane %v2666_v13, 4  ;;  %v835_v49 = vperm.slane %v831_v19, %v2479_v45  ;;  %v794_v59 = vrot.slane %v781_v23, 4 }
 0x1b8   :  { %v793_v46 = vperm.slane %v785_v38, %v2486_v54  ;;  %v810_v48 = vrot.slane %v805_v33, 4  ;;  %v612_v39 = vrot.slane %v607_v36, 4  ;;  %v850_v51 = vrot.slane %v829_v37, 4 }
 0x1b9   :  { %v839_v50 = vsel %vm222_vm10, %v824_v20, %v838_v44  ;;  %v614_v40 = vrot.slane %v595_v35, 4  ;;  %v782_v57 = vrot.slane %v770_v34, 4  ;;  %v848_v3 = vrot.slane %v835_v49, 4 }
 0x1ba   :  { %v2704_v52 = vsel %vm222_vm10, %v810_v48, %v793_v46  ;;  %v613_v55 = vsel %vm222_vm10, %v612_v39, %v595_v35  ;;  %v812_v56 = vrot.slane %v793_v46, 4  ;;  %v851_v62 = vsel %vm222_vm10, %v835_v49, %v850_v51 }
 0x1bb   :  { %1156 = vrot.lane.b32.xlu1 %v2704_v52, %s2328_s22  ;;  %v624_v61 = vmul.f32 %v613_v55, %v2656_v1  ;;  %v847_v0 = vperm.slane %v839_v50, %v2486_v54  ;;  %v859_v2 = vperm.slane %v851_v62, %v2486_v54  ;;  %v795_v42 = vsel %vm222_vm10, %v794_v59, %v2647_v58 }
 0x1bc   :  { %v2712_v63 = vsel %vm222_vm10, %v805_v33, %v812_v56  ;;  %v615_v5 = vsel %vm222_vm10, %v607_v36, %v614_v40  ;;  %v783_v27 = vsel %vm222_vm10, %v782_v57, %v764_v8  ;;  %v849_v10 = vsel %vm222_vm10, %v848_v3, %v829_v37  ;;  %v195_v36 = vpop.f32.mrf.mxu0 }
 0x1bd   :  { %978 = vrot.lane.b32.xlu2 %v624_v61, %s2328_s22  ;;  %1183 = vrot.lane.b32.xlu0 %v2712_v63, %s2328_s22  ;;  %v866_v43 = vrot.slane %v847_v0, 4  ;;  %v864_v6 = vrot.slane %v859_v2, 4  ;;  %v625_v7 = vmul.f32 %v615_v5, %v2656_v1  ;;  %v801_v11 = vperm.slane %v795_v42, %v2486_v54 }
 0x1be   :  { %v836_v12 = vrot.slane %v824_v20, 4  ;;  %v789_v16 = vperm.slane %v783_v27, %v2486_v54  ;;  %v855_v17 = vperm.slane %v849_v10, %v2486_v54 }
 0x1bf   :  { %v2728_v47 = vsel %vm222_vm10, %v859_v2, %v866_v43  ;;  %v2731_v58 = vsel %vm222_vm10, %v864_v6, %v847_v0  ;;  %v806_v1 = vrot.slane %v801_v11, 4 }
 0x1c0   :  { %v837_v8 = vsel %vm222_vm10, %v836_v12, %v2666_v13  ;;  %v808_v21 = vrot.slane %v789_v16, 4  ;;  %v860_v23 = vrot.slane %v855_v17, 4 }
 0x1c1   :  { %v2742_v24 = vsel %vm222_vm10, %v806_v1, %v789_v16  ;;  %v843_v25 = vperm.slane %v837_v8, %v2486_v54 }
 0x1c2   :  { %v2748_v26 = vsel %vm222_vm10, %v801_v11, %v808_v21 }
 0x1c3   :  { %1005 = vrot.lane.b32.xlu1 %v625_v7, %s2328_s22  ;;  %v2751_v28 = vsel %vm222_vm10, %v860_v23, %v843_v25  ;;  %v862_v13 = vrot.slane %v843_v25, 4 }
 0x1c5   :  { %1291 = vrot.lane.b32.xlu2 %v2728_v47, %s2328_s22  ;;  %1264 = vrot.lane.b32.xlu0 %v2731_v58, %s2328_s22  ;;  %v2758_v29 = vsel %vm222_vm10, %v855_v17, %v862_v13 }
 0x1cb   :  { %1102 = vrot.lane.b32.xlu1 %v2742_v24, %s2328_s22 }
 0x1cd   :  { %1129 = vrot.lane.b32.xlu0 %v2748_v26, %s2328_s22  ;;  %1210 = vrot.lane.b32.xlu2 %v2751_v28, %s2328_s22 }
 0x1d3   :  { %1237 = vrot.lane.b32.xlu1 %v2758_v29, %s2328_s22 }
 0x1d5   :  { %173 = vrot.lane.b32.xlu0 %v2411_v18, %s2321_s16 }
 0x1f0   :  { %v952_v9 = vpop.permute.xlu2 %951 }
 0x20d   :  { %v1060_v31 = vpop.permute.xlu2 %1059 }
 0x212   :  { %v870_v32 = vpop.permute.xlu1 %869 }
 0x213   :  { %2050 = vmatpush.xpose.msk.msra.mxu3 %vm871_vm11, %v870_v32  ;;  %v898_v34 = vpop.permute.xlu0 %897 }
 0x216   :  { %2051 = vmatmul.msk.f32.vlgmr.msra.gmra.mxu3 %vm871_vm11, %v2583_v53 }
 0x217   :  { %2052 = vmatpush.xpose.msk.msrb.mxu3 %vm871_vm11, %v898_v34  ;;  %v979_v30 = vpop.permute.xlu2 %978 }
 0x21a   :  { %v925_v41 = vpop.permute.xlu1 %924 }
 0x21b   :  { %2056 = vmatpush.xpose.msk.msra.mxu3 %vm871_vm11, %v952_v9  ;;  %2054 = vmatpush.xpose.msk.msrb.mxu0 %vm871_vm11, %v925_v41 }
 0x21e   :  { %2053 = vmatmul.msk.f32.vlgmr.msrb.gmra.mxu3 %vm871_vm11, %v2588_v60  ;;  %2055 = vmatmul.msk.f32.vlgmr.msrb.gmra.mxu0 %vm871_vm11, %v2616_v15 }
 0x21f   :  { %2058 = vmatpush.xpose.msk.msra.mxu0 %vm871_vm11, %v979_v30  ;;  %2064 = vmatpush.xpose.msk.msrb.mxu3 %vm871_vm11, %v1060_v31  ;;  %v1292_v15 = vpop.permute.xlu2 %1291  ;;  %v364_v31 = vld [vmem:[%s3085_s4] sm:$0x1] }
 0x226   :  { %2057 = vmatmul.msk.f32.vlgmr.msra.gmra.mxu3 %vm871_vm11, %v2542_v4  ;;  %2059 = vmatmul.msk.f32.vlgmr.msra.gmra.mxu0 %vm871_vm11, %v624_v61  ;;  %v1033_v18 = vpop.permute.xlu0 %1032 }
 0x227   :  { %2062 = vmatpush.xpose.msk.msrb.mxu2 %vm871_vm11, %v1033_v18  ;;  %v1211_v20 = vpop.permute.xlu2 %1210 }
 0x22a   :  { %2063 = vmatmul.msk.f32.vlgmr.msrb.gmra.mxu2 %vm871_vm11, %v2673_v22 }
 0x22d   :  { %v1157_v53 = vpop.permute.xlu1 %1156 }
 0x22e   :  { %2065 = vmatmul.msk.f32.vlgmr.msrb.gmra.mxu3 %vm871_vm11, %v2669_v14  ;;  %2070 = vmatpush.xpose.msk.msra.mxu2 %vm871_vm11, %v1157_v53 }
 0x22f   :  { %v1184_v60 = vpop.permute.xlu0 %1183 }
 0x230   :  { %2072 = vmatpush.xpose.msk.msra.mxu3 %vm871_vm11, %v1184_v60 }
 0x232   :  { %2071 = vmatmul.msk.f32.vlgmr.msra.gmra.mxu2 %vm871_vm11, %v2704_v52 }
 0x234   :  { %2080 = vmatpush.xpose.msk.msrb.mxu3 %vm871_vm11, %v1292_v15 }
 0x235   :  { %v1006_v4 = vpop.permute.xlu1 %1005 }
 0x236   :  { %2073 = vmatmul.msk.f32.vlgmr.msra.gmra.mxu3 %vm871_vm11, %v2712_v63  ;;  %2060 = vmatpush.xpose.msk.msrb.mxu1 %vm871_vm11, %v1006_v4 }
 0x237   :  { %v1265_v22 = vpop.permute.xlu0 %1264 }
 0x238   :  { %2078 = vmatpush.xpose.msk.msrb.mxu2 %vm871_vm11, %v1265_v22 }
 0x239   :  { %2061 = vmatmul.msk.f32.vlgmr.msrb.gmra.mxu1 %vm871_vm11, %v625_v7 }
 0x23b   :  { %2079 = vmatmul.msk.f32.vlgmr.msrb.gmra.mxu2 %vm871_vm11, %v2731_v58 }
 0x23d   :  { %v1103_v14 = vpop.permute.xlu1 %1102 }
 0x23e   :  { %2081 = vmatmul.msk.f32.vlgmr.msrb.gmra.mxu3 %vm871_vm11, %v2728_v47  ;;  %2066 = vmatpush.xpose.msk.msrb.mxu0 %vm871_vm11, %v1103_v14 }
 0x23f   :  { %v1130_v33 = vpop.permute.xlu0 %1129 }
 0x240   :  { %2068 = vmatpush.xpose.msk.msra.mxu1 %vm871_vm11, %v1130_v33  ;;  %v2082_v33 = vadd.f32 -1.0, %v364_v31 }
 0x241   :  { %2067 = vmatmul.msk.f32.vlgmr.msrb.gmra.mxu0 %vm871_vm11, %v2742_v24 }
 0x242   :  { %2074 = vmatpush.xpose.msk.msra.mxu0 %vm871_vm11, %v1211_v20 }
 0x243   :  { %2069 = vmatmul.msk.f32.vlgmr.msra.gmra.mxu1 %vm871_vm11, %v2748_v26 }
 0x245   :  { %v1238_v35 = vpop.permute.xlu1 %1237 }
 0x246   :  { %2076 = vmatpush.xpose.msk.msrb.mxu1 %vm871_vm11, %v1238_v35 }
 0x247   :  { %v174_v37 = vpop.permute.xlu0 %173 }
 0x248   :  { %v196_v38 = vadd.f32 %v195_v36, %v174_v37 }
 0x249   :  { %2075 = vmatmul.msk.f32.vlgmr.msra.gmra.mxu0 %vm871_vm11, %v2751_v28 }
 0x24a   :  { %v198_v19 = vmax.f32 %v196_v38, 0.0 }
 0x24b   :  { %2077 = vmatmul.msk.f32.vlgmr.msrb.gmra.mxu1 %vm871_vm11, %v2758_v29 }
 0x24c   :  { %212 = vrot.lane.b32.xlu0 %v198_v19, %s2329_s23  ;;  %206 = vrot.lane.b32.xlu1 %v198_v19, %s2325_s19 }
 0x24d   :  { %218 = vrot.lane.b32.xlu2 %v198_v19, %s2330_s24 }
 0x254   :  { %203 = vrot.lane.b32.xlu0 %v198_v19, %s2322_s7  ;;  %200 = vrot.lane.b32.xlu1 %v198_v19, %s2328_s22 }
 0x255   :  { %215 = vrot.lane.b32.xlu2 %v198_v19, %s2323_s17 }
 0x25d   :  { %209 = vrot.lane.b32.xlu2 %v198_v19, %s2321_s16 }
 0x299   :  { %v893_v46 = vpop.f32.mrf.mxu3 }
 0x29a   :  { %v1085_v23 = vmax.f32 %v893_v46, 0.0 }
 0x29b   :  { %v947_v57 = vpop.f32.mrf.mxu0 }
 0x29c   :  { %v1087_v25 = vmax.f32 %v947_v57, 0.0 }
 0x2a1   :  { %v920_v39 = vpop.f32.mrf.mxu3 }
 0x2a2   :  { %v1086_v13 = vmax.f32 %v920_v39, 0.0 }
 0x2a3   :  { %v1001_v32 = vpop.f32.mrf.mxu0 }
 0x2a4   :  { %v1089_v35 = vmax.f32 %v1001_v32, 0.0 }
 0x2a7   :  { %v219_v44 = vpop.permute.xlu2 %218 }
 0x2a8   :  { %v240_v49 = vrot.slane %v219_v44, 4 }
 0x2a9   :  { %v974_v0 = vpop.f32.mrf.mxu3 }
 0x2aa   :  { %v1088_v34 = vmax.f32 %v974_v0, 0.0 }
 0x2ad   :  { %v1055_v17 = vpop.f32.mrf.mxu2 }
 0x2ae   :  { %v1091_v22 = vmax.f32 %v1055_v17, 0.0 }
 0x2af   :  { %v216_v48 = vpop.permute.xlu2 %215 }
 0x2b0   :  { %v234_v56 = vrot.slane %v216_v48, 4 }
 0x2b1   :  { %v1082_v9 = vpop.f32.mrf.mxu3 }
 0x2b2   :  { %v1092_v4 = vmax.f32 %v1082_v9, 0.0 }
 0x2b6   :  { %v1028_v18 = vpop.f32.mrf.mxu1 }
 0x2b7   :  { %v210_v50 = vpop.permute.xlu2 %209  ;;  %v1090_v38 = vmax.f32 %v1028_v18, 0.0 }
 0x2b8   :  { %v235_v59 = vsel %vm222_vm10, %v234_v56, %v210_v50 }
 0x2b9   :  { %v239_v2 = vperm.slane %v235_v59, %v2479_v45 }
 0x2be   :  { %v213_v51 = vpop.permute.xlu0 %212  ;;  %v207_v55 = vpop.permute.xlu1 %206 }
 0x2bf   :  { %v241_v61 = vsel %vm222_vm10, %v240_v49, %v213_v51  ;;  %v228_v3 = vrot.slane %v207_v55, 4  ;;  %v365_v51 = vld [vmem:[%s3085_s4 + $0x1] sm:$0x1]  ;;  %v1179_v55 = vpop.f32.mrf.mxu2  ;;  %s2331_s4 = smov 24  }
 0x2c0   :  { %v245_v62 = vperm.slane %v241_v61, %v2479_v45  ;;  %v1319_v61 = vmul.f32 1e+30, %v2082_v33  ;;  %v2083_v59 = vadd.f32 -1.0, %v365_v51 }
 0x2c2   :  { %v252_v40 = vrot.slane %v245_v62, 4 }
 0x2c4   :  { %v253_v42 = vsel %vm222_vm10, %v252_v40, %v239_v2  ;;  %v1206_v40 = vpop.f32.mrf.mxu3 }
 0x2c5   :  { %v257_v10 = vperm.slane %v253_v42, %v2486_v54 }
 0x2c6   :  { %v204_v5 = vpop.permute.xlu0 %203  ;;  %v201_v43 = vpop.permute.xlu1 %200 }
 0x2c7   :  { %v221_v6 = vrot.slane %v204_v5, 4  ;;  %v229_v7 = vsel %vm222_vm10, %v228_v3, %v201_v43  ;;  %v258_v8 = vrot.slane %v257_v10, 4  ;;  %v1355_v3 = vperm.slane %v1319_v61, 0 }
 0x2c8   :  { %v233_v27 = vperm.slane %v229_v7, %v2479_v45  ;;  %v1152_v7 = vpop.f32.mrf.mxu1  ;;  %v2126_v61 = vpack.i.bf16 %v2712_v63, %v2704_v52 }
 0x2c9   :  { %v223_v11 = vsel %vm222_vm10, %v221_v6, %v198_v19  ;;  %v1320_v6 = vmul.f32 1e+30, %v2083_v59 }
 0x2ca   :  { %v227_v12 = vperm.slane %v223_v11, %v2479_v45  ;;  %v246_v16 = vrot.slane %v233_v27, 4  ;;  %v1125_v11 = vpop.f32.mrf.mxu0 }
 0x2cb   :  { %v1356_v31 = vperm.slane %v1320_v6, 0 }
 0x2cc   :  { %v247_v1 = vsel %vm222_vm10, %v246_v16, %v227_v12 }
 0x2cd   :  { %v251_v21 = vperm.slane %v247_v1, %v2486_v54 }
 0x2cf   :  { %v260_v30 = vrot.slane %v251_v21, 4  ;;  %v259_v41 = vsel %vm222_vm10, %v258_v8, %v251_v21 }
 0x2d0   :  { %v1095_v53 = vadd.f32 %v1087_v25, %v259_v41  ;;  %v1094_v60 = vadd.f32 %v1086_v13, %v259_v41  ;;  %v1093_v15 = vadd.f32 %v1085_v23, %v259_v41  ;;  %v1096_v20 = vadd.f32 %v1088_v34, %v259_v41  ;;  %v1287_v23 = vpop.f32.mrf.mxu2 }
 0x2d1   :  { %v261_v14 = vsel %vm222_vm10, %v257_v10, %v260_v30 }
 0x2d2   :  { %v1323_v36 = vmax.f32 %v1095_v53, 1e-06  ;;  %v1322_v37 = vmax.f32 %v1094_v60, 1e-06  ;;  %v1321_v19 = vmax.f32 %v1093_v15, 1e-06  ;;  %v1099_v44 = vadd.f32 %v1091_v22, %v261_v14 }
 0x2d3   :  { %v1100_v46 = vadd.f32 %v1092_v4, %v261_v14  ;;  %v1097_v48 = vadd.f32 %v1089_v35, %v261_v14  ;;  %v1098_v39 = vadd.f32 %v1090_v38, %v261_v14  ;;  %v1324_v50 = vmax.f32 %v1096_v20, 1e-06  ;;  %v1314_v4 = vpop.f32.mrf.mxu3 }
 0x2d4   :  { %2159 = vlog2.f32 %v1323_v36  ;;  %v1327_v49 = vmax.f32 %v1099_v44, 1e-06 }
 0x2d5   :  { %2161 = vlog2.f32 %v1322_v37  ;;  %v1328_v56 = vmax.f32 %v1100_v46, 1e-06  ;;  %v1325_v62 = vmax.f32 %v1097_v48, 1e-06  ;;  %v1326_v0 = vmax.f32 %v1098_v39, 1e-06  ;;  %v1233_v37 = vpop.f32.mrf.mxu0 }
 0x2d6   :  { %2163 = vlog2.f32 %v1321_v19  ;;  %v1260_v19 = vpop.f32.mrf.mxu1 }
 0x2d7   :  { %2165 = vlog2.f32 %v1327_v49 }
 0x2d8   :  { %2167 = vlog2.f32 %v1324_v50 }
 0x2d9   :  { %2169 = vlog2.f32 %v1328_v56 }
 0x2da   :  { %v2160_v2 = vpop.eup %2159  ;;  %2171 = vlog2.f32 %v1325_v62 }
 0x2db   :  { %v2162_v57 = vpop.eup %2161  ;;  %v1334_v42 = vmul.f32 0.6931472, %v2160_v2  ;;  %2173 = vlog2.f32 %v1326_v0 }
 0x2dc   :  { %v1332_v5 = vmul.f32 0.6931472, %v2162_v57  ;;  %v2164_v43 = vpop.eup %2163 }
 0x2dd   :  { %v1347_v27 = vadd.f32 %v1334_v42, %v1179_v55  ;;  %v2166_v10 = vpop.eup %2165  ;;  %v1330_v16 = vmul.f32 0.6931472, %v2164_v43 }
 0x2de   :  { %v1346_v12 = vadd.f32 %v1332_v5, %v1152_v7  ;;  %v2168_v17 = vpop.eup %2167  ;;  %v1342_v8 = vmul.f32 0.6931472, %v2166_v10 }
 0x2df   :  { %v1361_v1 = vadd.f32 %v1355_v3, %v1347_v27  ;;  %v2170_v21 = vpop.eup %2169  ;;  %v1345_v13 = vadd.f32 %v1330_v16, %v1125_v11  ;;  %v1336_v9 = vmul.f32 0.6931472, %v2168_v17 }
 0x2e0   :  { %v2835_v25 = vadd.f32 %v1355_v3, %v1346_v12  ;;  %v1351_v34 = vadd.f32 %v1342_v8, %v1287_v23  ;;  %v1344_v30 = vmul.f32 0.6931472, %v2170_v21  ;;  %v2172_v41 = vpop.eup %2171 }
 0x2e1   :  { %v1373_v32 = vsel %vm871_vm11, %v1361_v1, -inf  ;;  %v1359_v53 = vadd.f32 %v1355_v3, %v1345_v13  ;;  %v1348_v60 = vadd.f32 %v1336_v9, %v1206_v40  ;;  %v2174_v15 = vpop.eup %2173  ;;  %v1338_v33 = vmul.f32 0.6931472, %v2172_v41 }
 0x2e2   :  { %1374 = vmax.xlane.f32.xlu1 %v1373_v32  ;;  %v1370_v18 = vsel %vm871_vm11, %v2835_v25, -inf  ;;  %v1352_v14 = vadd.f32 %v1344_v30, %v1314_v4  ;;  %v1365_v20 = vadd.f32 %v1356_v31, %v1351_v34  ;;  %v1340_v35 = vmul.f32 0.6931472, %v2174_v15 }
 0x2e3   :  { %1371 = vmax.xlane.f32.xlu0 %v1370_v18  ;;  %v1367_v22 = vsel %vm871_vm11, %v1359_v53, -inf  ;;  %v2841_v36 = vadd.f32 %v1355_v3, %v1348_v60  ;;  %v1349_v46 = vadd.f32 %v1338_v33, %v1233_v37 }
 0x2e4   :  { %1368 = vmax.xlane.f32.xlu2 %v1367_v22  ;;  %v1366_v38 = vadd.f32 %v1356_v31, %v1352_v14  ;;  %v1385_v44 = vsel %vm871_vm11, %v1365_v20, -inf  ;;  %v1350_v48 = vadd.f32 %v1340_v35, %v1260_v19  ;;  %v2136_v19 = vpack.i.bf16 %v2728_v47, %v2748_v26 }
 0x2e5   :  { %v1376_v39 = vsel %vm871_vm11, %v2841_v36, -inf  ;;  %v1363_v50 = vadd.f32 %v1356_v31, %v1349_v46 }
 0x2e6   :  { %v1388_v49 = vsel %vm871_vm11, %v1366_v38, -inf  ;;  %v1364_v51 = vadd.f32 %v1356_v31, %v1350_v48 }
 0x2e7   :  { %v1379_v55 = vsel %vm871_vm11, %v1363_v50, -inf }
 0x2e8   :  { %v1382_v56 = vsel %vm871_vm11, %v1364_v51, -inf }
 0x2ea   :  { %1386 = vmax.xlane.f32.xlu1 %v1385_v44 }
 0x2eb   :  { %1377 = vmax.xlane.f32.xlu0 %v1376_v39 }
 0x2ec   :  { %1389 = vmax.xlane.f32.xlu2 %v1388_v49 }
 0x2f2   :  { %1380 = vmax.xlane.f32.xlu1 %v1379_v55 }
 0x2f3   :  { %1383 = vmax.xlane.f32.xlu0 %v1382_v56 }
 0x307   :  { %2127 = vrot.lane.b32.xlu0 %v2126_v61, %s2322_s7 }
 0x355   :  { %v1375_v62 = vpop.xlane.xlu1 %1374 }
 0x356   :  { %v1393_v59 = vsub.f32 %v1361_v1, %v1375_v62  ;;  %v1372_v40 = vpop.xlane.xlu0 %1371 }
 0x357   :  { %v1369_v2 = vpop.xlane.xlu2 %1368  ;;  %v1392_v21 = vsub.f32 %v2835_v25, %v1372_v40 }
 0x358   :  { %v1403_v0 = vmul.f32 1.442695, %v1393_v59  ;;  %v1391_v57 = vsub.f32 %v1359_v53, %v1369_v2 }
 0x359   :  { %v1401_v32 = vmul.f32 1.442695, %v1392_v21 }
 0x35a   :  { %2175 = vpow2.f32 %v1403_v0  ;;  %v1399_v3 = vmul.f32 1.442695, %v1391_v57 }
 0x35c   :  { %2177 = vpow2.f32 %v1399_v3 }
 0x35d   :  { %v1387_v42 = vpop.xlane.xlu1 %1386 }
 0x35e   :  { %v1378_v5 = vpop.xlane.xlu0 %1377  ;;  %v1397_v1 = vsub.f32 %v1365_v20, %v1387_v42 }
 0x35f   :  { %v1390_v6 = vpop.xlane.xlu2 %1389  ;;  %v1394_v41 = vsub.f32 %v2841_v36, %v1378_v5  ;;  %v2141_v36 = vpack.i.bf16 %v2758_v29, %v2751_v28 }
 0x360   :  { %v2852_v43 = vpop.eup %2175  ;;  %v1398_v7 = vsub.f32 %v1366_v38, %v1390_v6  ;;  %v1411_v9 = vmul.f32 1.442695, %v1397_v1  ;;  %v2131_v38 = vpack.i.bf16 %v2731_v58, %v2742_v24 }
 0x361   :  { %v1421_v52 = vsel %vm871_vm11, %v2852_v43, 0.0  ;;  %v1405_v53 = vmul.f32 1.442695, %v1394_v41 }
 0x362   :  { %1422 = vadd.xlane.f32.xlu2 %v1421_v52  ;;  %v2856_v63 = vpop.eup %2177  ;;  %v1413_v27 = vmul.f32 1.442695, %v1398_v7 }
 0x363   :  { %v1415_v10 = vsel %vm871_vm11, %v2856_v63, 0.0 }
 0x364   :  { %2179 = vpow2.f32 %v1413_v27  ;;  %1416 = vadd.xlane.f32.xlu0 %v1415_v10 }
 0x365   :  { %v1381_v11 = vpop.xlane.xlu1 %1380 }
 0x366   :  { %v1395_v12 = vsub.f32 %v1363_v50, %v1381_v11  ;;  %v1384_v16 = vpop.xlane.xlu0 %1383 }
 0x367   :  { %v1396_v17 = vsub.f32 %v1364_v51, %v1384_v16 }
 0x368   :  { %v1407_v8 = vmul.f32 1.442695, %v1395_v12 }
 0x369   :  { %v1409_v23 = vmul.f32 1.442695, %v1396_v17 }
 0x36a   :  { %2181 = vpow2.f32 %v1407_v8  ;;  %v2861_v13 = vpop.eup %2179 }
 0x36b   :  { %2183 = vpow2.f32 %v1409_v23  ;;  %v1436_v31 = vsel %vm871_vm11, %v2861_v13, 0.0 }
 0x36c   :  { %1437 = vadd.xlane.f32.xlu0 %v1436_v31  ;;  %2185 = vpow2.f32 %v1411_v9 }
 0x36d   :  { %2187 = vpow2.f32 %v1401_v32 }
 0x36e   :  { %2189 = vpow2.f32 %v1405_v53 }
 0x370   :  { %v2865_v34 = vpop.eup %2181 }
 0x371   :  { %v2867_v30 = vpop.eup %2183  ;;  %v1427_v25 = vsel %vm871_vm11, %v2865_v34, 0.0 }
 0x372   :  { %v1430_v18 = vsel %vm871_vm11, %v2867_v30, 0.0  ;;  %1428 = vadd.xlane.f32.xlu2 %v1427_v25  ;;  %v2874_v60 = vpop.eup %2185 }
 0x373   :  { %1431 = vadd.xlane.f32.xlu1 %v1430_v18  ;;  %v2876_v15 = vpop.eup %2187  ;;  %v1433_v22 = vsel %vm871_vm11, %v2874_v60, 0.0 }
 0x374   :  { %v1418_v33 = vsel %vm871_vm11, %v2876_v15, 0.0  ;;  %v2882_v35 = vpop.eup %2189 }
 0x375   :  { %v1424_v37 = vsel %vm871_vm11, %v2882_v35, 0.0 }
 0x379   :  { %v2128_v4 = vpop.permute.xlu0 %2127 }
 0x37a   :  { %v2130_v14 = vunpack.i.h.bf16 %v2128_v4  ;;  %v2129_v20 = vunpack.i.l.bf16 %v2128_v4  ;;  %1434 = vadd.xlane.f32.xlu2 %v1433_v22 }
 0x37b   :  { %1419 = vadd.xlane.f32.xlu1 %v1418_v33 }
 0x37c   :  { %1632 = vmatpush.msra.mxu2 %v2129_v20  ;;  %1658 = vmatpush.msra.mxu3 %v2130_v14 }
 0x380   :  { %2142 = vrot.lane.b32.xlu0 %v2141_v36, %s2322_s7 }
 0x383   :  { %1425 = vadd.xlane.f32.xlu1 %v1424_v37 }
 0x392   :  { %2132 = vrot.lane.b32.xlu2 %v2131_v38, %s2322_s7 }
 0x39c   :  { %2137 = vrot.lane.b32.xlu1 %v2136_v19, %s2322_s7 }
 0x3d5   :  { %v1423_v44 = vpop.xlane.xlu2 %1422 }
 0x3d6   :  { %2191 = vrcp.f32 %v1423_v44  ;;  %v1478_v50 = vand.u32 2147483648, %v1423_v44  ;;  %v1476_v51 = vand.u32 2147483647, %v1423_v44  ;;  %vm1472_vm13 = vweird.f32 %v1423_v44 }
 0x3d7   :  { %v1417_v46 = vpop.xlane.xlu0 %1416 }
 0x3d8   :  { %2193 = vrcp.f32 %v1417_v46  ;;  %v1479_v47 = vor.u32 1.1754944e-38, %v1478_v50  ;;  %vm1477_vm15 = vcmp.eq.f32.partialorder %v1476_v51, 8.507059e+37  ;;  %v1450_v7 = vand.u32 2147483648, %v1417_v46 }
 0x3d9   :  { %vm1444_vm2 = vweird.f32 %v1417_v46 }
 0x3da   :  { %v1451_v12 = vor.u32 1.1754944e-38, %v1450_v7 }
 0x3dc   :  { %v2192_v28 = vpop.eup %2191 }
 0x3dd   :  { %v1468_v29 = vmul.f32 %v2192_v28, %v1423_v44  ;;  %vm1473_vm12 = vweird.f32 %v2192_v28 }
 0x3de   :  { %v2194_v39 = vpop.eup %2193  ;;  %vm1474_vm14 = vmor %vm1472_vm13, %vm1473_vm12 }
 0x3df   :  { %v1469_v48 = vsub.f32 1.0, %v1468_v29  ;;  %v1440_v24 = vmul.f32 %v2194_v39, %v1417_v46  ;;  %v2900_v59 = vpop.xlane.xlu0 %1437  ;;  %vm1445_vm1 = vweird.f32 %v2194_v39 }
 0x3e0   :  { %vm1446_vm3 = vmor %vm1444_vm2, %vm1445_vm1 }
 0x3e1   :  { %v1470_v49 = vmul.f32 %v2192_v28, %v1469_v48  ;;  %v1441_v62 = vsub.f32 1.0, %v1440_v24 }
 0x3e3   :  { %v1471_v58 = vadd.f32 %v2192_v28, %v1470_v49  ;;  %v1442_v2 = vmul.f32 %v2194_v39, %v1441_v62 }
 0x3e5   :  { %v1475_v55 = vsel %vm1474_vm14, %v2192_v28, %v1471_v58  ;;  %v2895_v26 = vpop.xlane.xlu2 %1428  ;;  %v1443_v5 = vadd.f32 %v2194_v39, %v1442_v2 }
 0x3e6   :  { %v2897_v56 = vpop.xlane.xlu1 %1431  ;;  %2195 = vrcp.f32 %v2895_v26  ;;  %v1480_v61 = vsel %vm1477_vm15, %v1479_v47, %v1475_v55  ;;  %v1506_v9 = vand.u32 2147483648, %v2895_v26  ;;  %vm1500_vm7 = vweird.f32 %v2895_v26 }
 0x3e7   :  { %v1553_v40 = vmul.f32 %v2852_v43, %v1480_v61  ;;  %2197 = vrcp.f32 %v2900_v59  ;;  %v1448_v43 = vand.u32 2147483647, %v1417_v46  ;;  %v1447_v10 = vsel %vm1446_vm3, %v2194_v39, %v1443_v5 }
 0x3e8   :  { %v1504_v14 = vand.u32 2147483647, %v2895_v26  ;;  %v1507_v29 = vor.u32 1.1754944e-38, %v1506_v9 }
 0x3e9   :  { %2086 = vmatmul.msk.f32.vlgmr.msra.gmra.mxu2 %vm871_vm11, %v1553_v40  ;;  %vm1449_vm4 = vcmp.eq.f32.partialorder %v1448_v43, 8.507059e+37 }
 0x3ea   :  { %v1452_v23 = vsel %vm1449_vm4, %v1451_v12, %v1447_v10  ;;  %vm1505_vm14 = vcmp.eq.f32.partialorder %v1504_v14, 8.507059e+37 }
 0x3eb   :  { %v1551_v33 = vmul.f32 %v2856_v63, %v1452_v23 }
 0x3ec   :  { %v2903_v0 = vpop.eup %2195 }
 0x3ed   :  { %v1496_v57 = vmul.f32 %v2903_v0, %v2895_v26  ;;  %v1435_v3 = vpop.xlane.xlu2 %1434  ;;  %v2912_v52 = vpop.eup %2197  ;;  %vm1501_vm5 = vweird.f32 %v2903_v0 }
 0x3ee   :  { %v2909_v42 = vpop.xlane.xlu1 %1419  ;;  %2199 = vrcp.f32 %v1435_v3  ;;  %v1538_v1 = vmul.f32 %v2912_v52, %v2900_v59  ;;  %v1534_v41 = vand.u32 2147483648, %v1435_v3  ;;  %v1532_v4 = vand.u32 2147483647, %v1435_v3  ;;  %vm2933_vm8 = vmor %vm1500_vm7, %vm1501_vm5 }
 0x3ef   :  { %v1497_v6 = vsub.f32 1.0, %v1496_v57  ;;  %2201 = vrcp.f32 %v2909_v42  ;;  %vm1528_vm9 = vweird.f32 %v1435_v3  ;;  %vm1543_vm2 = vweird.f32 %v2912_v52 }
 0x3f0   :  { %2203 = vrcp.f32 %v2897_v56  ;;  %v1535_v46 = vor.u32 1.1754944e-38, %v1534_v41  ;;  %v1539_v28 = vsub.f32 1.0, %v1538_v1  ;;  %vm1533_vm13 = vcmp.eq.f32.partialorder %v1532_v4, 8.507059e+37 }
 0x3f1   :  { %v1498_v11 = vmul.f32 %v2903_v0, %v1497_v6  ;;  %v1464_v7 = vand.u32 2147483648, %v2909_v42  ;;  %v1462_v10 = vand.u32 2147483647, %v2909_v42 }
 0x3f2   :  { %v2926_v25 = vpop.permute.xlu0 %2142  ;;  %v1540_v55 = vmul.f32 %v2912_v52, %v1539_v28 }
 0x3f3   :  { %v1499_v32 = vadd.f32 %v2903_v0, %v1498_v11  ;;  %v2144_v38 = vunpack.i.l.bf16 %v2926_v25 }
 0x3f4   :  { %v2200_v27 = vpop.eup %2199 }
 0x3f5   :  { %v1524_v16 = vmul.f32 %v2200_v27, %v1435_v3  ;;  %v2133_v17 = vpop.permute.xlu2 %2132  ;;  %v2920_v21 = vpop.eup %2201  ;;  %vm1529_vm6 = vweird.f32 %v2200_v27  ;;  %v1503_v44 = vsel %vm2933_vm8, %v2903_v0, %v1499_v32  ;;  %vm1458_vm8 = vweird.f32 %v2909_v42 }
 0x3f6   :  { %v2918_v8 = vpop.xlane.xlu1 %1425  ;;  %v2135_v18 = vunpack.i.h.bf16 %v2133_v17  ;;  %v2134_v22 = vunpack.i.l.bf16 %v2133_v17  ;;  %v1454_v20 = vmul.f32 %v2920_v21, %v2909_v42  ;;  %v2938_v19 = vpop.eup %2203  ;;  %vm1530_vm12 = vmor %vm1528_vm9, %vm1529_vm6  ;;  %v1508_v51 = vsel %vm1505_vm14, %v1507_v29, %v1503_v44 }
 0x3f7   :  { %v1525_v31 = vsub.f32 1.0, %v1524_v16  ;;  %2205 = vrcp.f32 %v2918_v8  ;;  %v1510_v47 = vmul.f32 %v2938_v19, %v2897_v56  ;;  %v1490_v26 = vand.u32 2147483647, %v2918_v8 }
 0x3f8   :  { %1736 = vmatpush.msrb.mxu2 %v2135_v18  ;;  %1580 = vmatpush.msrb.mxu0 %v2134_v22  ;;  %v1455_v39 = vsub.f32 1.0, %v1454_v20  ;;  %v1492_v61 = vand.u32 2147483648, %v2918_v8  ;;  %v1555_v0 = vmul.f32 %v2865_v34, %v1508_v51  ;;  %vm1486_vm1 = vweird.f32 %v2918_v8 }
 0x3f9   :  { %v1526_v53 = vmul.f32 %v2200_v27, %v1525_v31  ;;  %2084 = vmatmul.msk.f32.vlgmr.msrb.gmra.mxu0 %vm871_vm11, %v1551_v33  ;;  %v1511_v57 = vsub.f32 1.0, %v1510_v47  ;;  %vm1459_vm4 = vweird.f32 %v2920_v21  ;;  %vm1491_vm5 = vcmp.eq.f32.partialorder %v1490_v26, 8.507059e+37 }
 0x3fa   :  { %1684 = vmatpush.msra.mxu0 %v2144_v38  ;;  %v1456_v62 = vmul.f32 %v2920_v21, %v1455_v39  ;;  %v1493_v3 = vor.u32 1.1754944e-38, %v1492_v61  ;;  %vm1542_vm6 = vweird.f32 %v2900_v59  ;;  %v1548_v34 = vand.u32 2147483648, %v2900_v59  ;;  %vm1460_vm9 = vmor %vm1458_vm8, %vm1459_vm4 }
 0x3fb   :  { %v1527_v37 = vadd.f32 %v2200_v27, %v1526_v53  ;;  %vm1544_vm7 = vmor %vm1542_vm6, %vm1543_vm2  ;;  %v1512_v16 = vmul.f32 %v2938_v19, %v1511_v57  ;;  %vm1515_vm14 = vweird.f32 %v2938_v19  ;;  %v1520_v42 = vand.u32 2147483648, %v2897_v56 }
 0x3fc   :  { %v1457_v5 = vadd.f32 %v2920_v21, %v1456_v62  ;;  %v1549_v1 = vor.u32 1.1754944e-38, %v1548_v34  ;;  %v2145_v18 = vunpack.i.h.bf16 %v2926_v25  ;;  %vm2013_vm4 = vcmask 130048  }
 0x3fd   :  { %v2206_v63 = vpop.eup %2205  ;;  %v1531_v48 = vsel %vm1530_vm12, %v2200_v27, %v1527_v37  ;;  %v1546_v27 = vand.u32 2147483647, %v2900_v59  ;;  %v1513_v9 = vadd.f32 %v2938_v19, %v1512_v16  ;;  %v1521_v4 = vor.u32 1.1754944e-38, %v1520_v42 }
 0x3fe   :  { %v1536_v49 = vsel %vm1533_vm13, %v1535_v46, %v1531_v48  ;;  %v1482_v50 = vmul.f32 %v2206_v63, %v2918_v8  ;;  %vm1487_vm15 = vweird.f32 %v2206_v63  ;;  %v1461_v17 = vsel %vm1460_vm9, %v2920_v21, %v1457_v5 }
 0x3ff   :  { %v1557_v58 = vmul.f32 %v2874_v60, %v1536_v49  ;;  %v1541_v60 = vadd.f32 %v2912_v52, %v1540_v55  ;;  %vm1488_vm3 = vmor %vm1486_vm1, %vm1487_vm15  ;;  %v1465_v8 = vor.u32 1.1754944e-38, %v1464_v7  ;;  %vm1547_vm12 = vcmp.eq.f32.partialorder %v1546_v27, 8.507059e+37 }
 0x400   :  { %v1483_v24 = vsub.f32 1.0, %v1482_v50  ;;  %vm1463_vm13 = vcmp.eq.f32.partialorder %v1462_v10, 8.507059e+37  ;;  %vm1514_vm15 = vweird.f32 %v2897_v56  ;;  %v1518_v21 = vand.u32 2147483647, %v2897_v56 }
 0x401   :  { %2090 = vmatmul.msk.f32.vlgmr.msrb.gmra.mxu2 %vm871_vm11, %v1557_v58  ;;  %2088 = vmatmul.msk.f32.vlgmr.msra.gmra.mxu0 %vm871_vm11, %v1555_v0  ;;  %v1545_v12 = vsel %vm1544_vm7, %v2912_v52, %v1541_v60  ;;  %v1466_v23 = vsel %vm1463_vm13, %v1465_v8, %v1461_v17  ;;  %vm1516_vm1 = vmor %vm1514_vm15, %vm1515_vm14 }
 0x402   :  { %v1484_v40 = vmul.f32 %v2206_v63, %v1483_v24  ;;  %v1550_v59 = vsel %vm1547_vm12, %v1549_v1, %v1545_v12  ;;  %v1552_v32 = vmul.f32 %v2876_v15, %v1466_v23  ;;  %v1517_v53 = vsel %vm1516_vm1, %v2938_v19, %v1513_v9 }
 0x403   :  { %v1558_v41 = vmul.f32 %v2861_v13, %v1550_v59  ;;  %vm1519_vm2 = vcmp.eq.f32.partialorder %v1518_v21, 8.507059e+37 }
 0x404   :  { %v1485_v2 = vadd.f32 %v2206_v63, %v1484_v40  ;;  %v1522_v22 = vsel %vm1519_vm2, %v1521_v4, %v1517_v53 }
 0x405   :  { %v1556_v56 = vmul.f32 %v2867_v30, %v1522_v22 }
 0x406   :  { %v1489_v6 = vsel %vm1488_vm3, %v2206_v63, %v1485_v2  ;;  %vm2016_vm3 = vcmask 195584  }
 0x407   :  { %v1494_v43 = vsel %vm1491_vm5, %v1493_v3, %v1489_v6 }
 0x408   :  { %v1554_v11 = vmul.f32 %v2882_v35, %v1494_v43 }
 0x40a   :  { %2087 = vmatmul.msk.f32.vlgmr.msra.gmra.mxu3 %vm871_vm11, %v1554_v11 }
 0x40e   :  { %v2138_v35 = vpop.permute.xlu1 %2137 }
 0x40f   :  { %v2140_v52 = vunpack.i.h.bf16 %v2138_v35  ;;  %v2139_v31 = vunpack.i.l.bf16 %v2138_v35 }
 0x411   :  { %1606 = vmatpush.msra.mxu1 %v2139_v31  ;;  %1762 = vmatpush.msrb.mxu3 %v2140_v52 }
 0x412   :  { %2085 = vmatmul.msk.f32.vlgmr.msra.gmra.mxu1 %vm871_vm11, %v1552_v32  ;;  %2091 = vmatmul.msk.f32.vlgmr.msrb.gmra.mxu3 %vm871_vm11, %v1558_v41 }
 0x413   :  { %1710 = vmatpush.msrb.mxu1 %v2145_v18 }
 0x41a   :  { %2089 = vmatmul.msk.f32.vlgmr.msrb.gmra.mxu1 %vm871_vm11, %v1556_v56 }
 0x46c   :  { %v1634_v15 = vpop.f32.mrf.mxu2 }
 0x46d   :  { %v1767_v25 = vrot.slane %v1634_v15, 4 }
 0x476   :  { %v1582_v13 = vpop.f32.mrf.mxu0 }
 0x477   :  { %v1769_v14 = vrot.slane %v1582_v13, 4  ;;  %v1768_v33 = vsel %vm222_vm10, %v1767_v25, %v1582_v13 }
 0x478   :  { %v1774_v19 = vperm.slane %v1768_v33, %v2479_v45 }
 0x479   :  { %v1770_v37 = vsel %vm222_vm10, %v1634_v15, %v1769_v14 }
 0x47a   :  { %v1778_v63 = vperm.slane %v1770_v37, %v2479_v45  ;;  %v1793_v50 = vrot.slane %v1774_v19, 4 }
 0x47c   :  { %v1805_v58 = vrot.slane %v1778_v63, 4 }
 0x47e   :  { %v1686_v36 = vpop.f32.mrf.mxu0 }
 0x47f   :  { %v1825_v44 = vrot.slane %v1686_v36, 4 }
 0x484   :  { %v1738_v20 = vpop.f32.mrf.mxu2 }
 0x485   :  { %v1823_v38 = vrot.slane %v1738_v20, 4  ;;  %v1826_v28 = vsel %vm222_vm10, %v1738_v20, %v1825_v44 }
 0x486   :  { %v1834_v24 = vperm.slane %v1826_v28, %v2479_v45 }
 0x487   :  { %v1824_v48 = vsel %vm222_vm10, %v1823_v38, %v1686_v36 }
 0x488   :  { %v1830_v47 = vperm.slane %v1824_v48, %v2479_v45  ;;  %v1861_v43 = vrot.slane %v1834_v24, 4 }
 0x48a   :  { %v1849_v7 = vrot.slane %v1830_v47, 4 }
 0x48d   :  { %v1660_v46 = vpop.f32.mrf.mxu3 }
 0x48e   :  { %v1779_v30 = vrot.slane %v1660_v46, 4 }
 0x48f   :  { %v1608_v29 = vpop.f32.mrf.mxu1 }
 0x490   :  { %v1780_v39 = vsel %vm222_vm10, %v1779_v30, %v1608_v29  ;;  %v1781_v49 = vrot.slane %v1608_v29, 4 }
 0x491   :  { %v1786_v51 = vperm.slane %v1780_v39, %v2479_v45 }
 0x492   :  { %v1782_v55 = vsel %vm222_vm10, %v1660_v46, %v1781_v49 }
 0x493   :  { %v1790_v26 = vperm.slane %v1782_v55, %v2479_v45  ;;  %v1791_v61 = vrot.slane %v1786_v51, 4  ;;  %v1794_v62 = vsel %vm222_vm10, %v1786_v51, %v1793_v50 }
 0x494   :  { %v1802_v40 = vperm.slane %v1794_v62, %v2486_v54 }
 0x495   :  { %v1792_v0 = vsel %vm222_vm10, %v1791_v61, %v1774_v19  ;;  %v1803_v2 = vrot.slane %v1790_v26, 4  ;;  %v1806_v60 = vsel %vm222_vm10, %v1790_v26, %v1805_v58  ;;  %v1764_v57 = vpop.f32.mrf.mxu3 }
 0x496   :  { %v1798_v3 = vperm.slane %v1792_v0, %v2486_v54  ;;  %v1814_v5 = vperm.slane %v1806_v60, %v2486_v54  ;;  %v1817_v6 = vrot.slane %v1802_v40, 4  ;;  %v1835_v34 = vrot.slane %v1764_v57, 4 }
 0x497   :  { %v1804_v27 = vsel %vm222_vm10, %v1803_v2, %v1778_v63  ;;  %v1712_v10 = vpop.f32.mrf.mxu1 }
 0x498   :  { %v1810_v11 = vperm.slane %v1804_v27, %v2486_v54  ;;  %v1815_v12 = vrot.slane %v1798_v3, 4  ;;  %v1818_v16 = vsel %vm222_vm10, 0.0, %v1817_v6  ;;  %v1821_v17 = vrot.slane %v1814_v5, 4 }
 0x499   :  { %v1879_v1 = vsel %vm222_vm10, %v1817_v6, %v1798_v3  ;;  %v1884_v8 = vrot.slane %v1818_v16, 4  ;;  %v1836_v59 = vsel %vm222_vm10, %v1835_v34, %v1712_v10  ;;  %v1837_v23 = vrot.slane %v1712_v10, 4 }
 0x49a   :  { %v1819_v9 = vrot.slane %v1810_v11, 4  ;;  %v1822_v35 = vsel %vm222_vm10, 0.0, %v1821_v17  ;;  %v1842_v42 = vperm.slane %v1836_v59, %v2479_v45  ;;  %v1816_v52 = vsel %vm222_vm10, 0.0, %v1815_v12 }
 0x49b   :  { %v1895_v31 = vrot.slane %v1822_v35, 4  ;;  %v1838_v21 = vsel %vm222_vm10, %v1764_v57, %v1837_v23  ;;  %v1883_v32 = vperm.slane %v1879_v1, %v2479_v45  ;;  %v1885_v41 = vsel %vm222_vm10, %v1884_v8, %v1816_v52 }
 0x49c   :  { %v1846_v18 = vperm.slane %v1838_v21, %v2479_v45  ;;  %v1847_v53 = vrot.slane %v1842_v42, 4  ;;  %v1850_v4 = vsel %vm222_vm10, %v1842_v42, %v1849_v7  ;;  %v1820_v22 = vsel %vm222_vm10, 0.0, %v1819_v9 }
 0x49d   :  { %v1858_v56 = vperm.slane %v1850_v4, %v2486_v54  ;;  %v1889_v13 = vperm.slane %v1885_v41, %v2479_v45  ;;  %v1890_v15 = vsel %vm222_vm10, %v1821_v17, %v1810_v11  ;;  %v1896_v14 = vsel %vm222_vm10, %v1895_v31, %v1820_v22 }
 0x49e   :  { %v1848_v25 = vsel %vm222_vm10, %v1847_v53, %v1830_v47  ;;  %v1859_v20 = vrot.slane %v1846_v18, 4  ;;  %v1862_v33 = vsel %vm222_vm10, %v1846_v18, %v1861_v43  ;;  %v1894_v36 = vperm.slane %v1890_v15, %v2479_v45 }
 0x49f   :  { %v1854_v37 = vperm.slane %v1848_v25, %v2486_v54  ;;  %v1870_v38 = vperm.slane %v1862_v33, %v2486_v54  ;;  %v1873_v19 = vrot.slane %v1858_v56, 4  ;;  %v1900_v44 = vperm.slane %v1896_v14, %v2479_v45 }
 0x4a0   :  { %v1860_v46 = vsel %vm222_vm10, %v1859_v20, %v1834_v24  ;;  %v1903_v63 = vrot.slane %v1883_v32, 4  ;;  %v1915_v30 = vrot.slane %v1894_v36, 4  ;;  %v1901_v28 = vrot.slane %v1889_v13, 4 }
 0x4a1   :  { %v1866_v29 = vperm.slane %v1860_v46, %v2486_v54  ;;  %v1871_v48 = vrot.slane %v1854_v37, 4  ;;  %v1874_v39 = vsel %vm222_vm10, 0.0, %v1873_v19  ;;  %v1877_v49 = vrot.slane %v1870_v38, 4 }
 0x4a2   :  { %v1933_v50 = vsel %vm222_vm10, %v1873_v19, %v1854_v37  ;;  %v1938_v51 = vrot.slane %v1874_v39, 4  ;;  %v1904_v58 = vsel %vm222_vm10, %v1889_v13, %v1903_v63  ;;  %v1916_v55 = vsel %vm222_vm10, %v1900_v44, %v1915_v30 }
 0x4a3   :  { %v1872_v47 = vsel %vm222_vm10, 0.0, %v1871_v48  ;;  %v1875_v26 = vrot.slane %v1866_v29, 4  ;;  %v1878_v24 = vsel %vm222_vm10, 0.0, %v1877_v49  ;;  %v1937_v61 = vperm.slane %v1933_v50, %v2479_v45 }
 0x4a4   :  { %v1949_v62 = vrot.slane %v1878_v24, 4  ;;  %v1912_v40 = vperm.slane %v1904_v58, %v2486_v54  ;;  %v1924_v0 = vperm.slane %v1916_v55, %v2486_v54  ;;  %v1902_v2 = vsel %vm222_vm10, %v1901_v28, %v1883_v32  ;;  %v2207_v28 = vld [vmem:[#allocation3 + $0x8] sm:$0xff] }
 0x4a5   :  { %v1908_v60 = vperm.slane %v1902_v2, %v2486_v54  ;;  %v1913_v57 = vrot.slane %v1900_v44, 4  ;;  %v1876_v3 = vsel %vm222_vm10, 0.0, %v1875_v26  ;;  %v1939_v5 = vsel %vm222_vm10, %v1938_v51, %v1872_v47  ;;  %v2208_v51 = vld [vmem:[#allocation3] sm:$0xff] }
 0x4a6   :  { %v1929_v6 = vrot.slane %v1924_v0, 4  ;;  %v1943_v34 = vperm.slane %v1939_v5, %v2479_v45  ;;  %v1944_v7 = vsel %vm222_vm10, %v1877_v49, %v1866_v29  ;;  %v1950_v43 = vsel %vm222_vm10, %v1949_v62, %v1876_v3 }
 0x4a7   :  { %v1914_v27 = vsel %vm222_vm10, %v1913_v57, %v1894_v36  ;;  %v1927_v10 = vrot.slane %v1908_v60, 4  ;;  %v1948_v11 = vperm.slane %v1944_v7, %v2479_v45  ;;  %v1954_v12 = vperm.slane %v1950_v43, %v2479_v45 }
 0x4a8   :  { %v1930_v16 = vsel %vm222_vm10, %v1929_v6, %v1912_v40  ;;  %v1920_v17 = vperm.slane %v1914_v27, %v2486_v54  ;;  %v1957_v1 = vrot.slane %v1937_v61, 4  ;;  %v1955_v8 = vrot.slane %v1943_v34, 4 }
 0x4a9   :  { %1997 = vrot.lane.b32.xlu1 %v1930_v16, %s2317_s21  ;;  %v1969_v59 = vrot.slane %v1948_v11, 4  ;;  %v1967_v23 = vrot.slane %v1954_v12, 4 }
 0x4aa   :  { %v1925_v9 = vrot.slane %v1920_v17, 4  ;;  %v1928_v35 = vsel %vm222_vm10, %v1920_v17, %v1927_v10  ;;  %v1958_v42 = vsel %vm222_vm10, %v1943_v34, %v1957_v1  ;;  %v1956_v52 = vsel %vm222_vm10, %v1955_v8, %v1937_v61 }
 0x4ab   :  { %1989 = vrot.lane.b32.xlu2 %v1928_v35, %s2313_s14  ;;  %v1966_v45 = vperm.slane %v1958_v42, %v2486_v54  ;;  %v1970_v31 = vsel %vm222_vm10, %v1954_v12, %v1969_v59  ;;  %v1962_v21 = vperm.slane %v1956_v52, %v2486_v54  ;;  %v1968_v32 = vsel %vm222_vm10, %v1967_v23, %v1948_v11 }
 0x4ac   :  { %v1978_v41 = vperm.slane %v1970_v31, %v2486_v54  ;;  %v1974_v18 = vperm.slane %v1968_v32, %v2486_v54  ;;  %v1926_v53 = vsel %vm222_vm10, %v1925_v9, %v1908_v60  ;;  %v1931_v54 = vrot.slane %v1912_v40, 4 }
 0x4ad   :  { %v1985_v4 = vrot.slane %v1966_v45, 4  ;;  %v1981_v22 = vrot.slane %v1962_v21, 4 }
 0x4ae   :  { %v1983_v56 = vrot.slane %v1978_v41, 4  ;;  %v1979_v13 = vrot.slane %v1974_v18, 4  ;;  %v1932_v33 = vsel %vm222_vm10, %v1924_v0, %v1931_v54 }
 0x4af   :  { %v1982_v15 = vsel %vm222_vm10, %v1974_v18, %v1981_v22  ;;  %v1986_v14 = vsel %vm222_vm10, %v1978_v41, %v1985_v4 }
 0x4b0   :  { %v1984_v25 = vsel %vm222_vm10, %v1983_v56, %v1966_v45  ;;  %1991 = vrot.lane.b32.xlu0 %v1982_v15, %s2313_s14  ;;  %v1980_v20 = vsel %vm222_vm10, %v1979_v13, %v1962_v21 }
 0x4b1   :  { %2007 = vrot.lane.b32.xlu1 %v1986_v14, %s2331_s4 }
 0x4b3   :  { %1999 = vrot.lane.b32.xlu2 %v1984_v25, %s2317_s21  ;;  %s2332_s21 = smov [#allocation9]  }
 0x4b4   :  { %s2027_s28 = sshll.u32 %s2332_s21, 4  ;;  %s2028_s28 = int_to_ptr.vmem [resolvable:$true] %s2027_s28 }
 0x4b8   :  { %2005 = vrot.lane.b32.xlu0 %v1932_v33, %s2331_s4 }
 0x505   :  { %v1990_v36 = vpop.permute.xlu2 %1989 }
 0x506   :  { %v2011_v48 = vsel %vm871_vm11, %v1926_v53, %v1990_v36 }
 0x50d   :  { %v2000_v19 = vpop.permute.xlu2 %1999 }
 0x51b   :  { %v1998_v37 = vpop.permute.xlu1 %1997 }
 0x51c   :  { %v2014_v39 = vsel %vm2013_vm4, %v2011_v48, %v1998_v37 }
 0x522   :  { %v1992_v38 = vpop.permute.xlu0 %1991 }
 0x523   :  { %v2012_v44 = vsel %vm871_vm11, %v1980_v20, %v1992_v38  ;;  %v2008_v46 = vpop.permute.xlu1 %2007 }
 0x524   :  { %v2015_v63 = vsel %vm2013_vm4, %v2012_v44, %v2000_v19 }
 0x525   :  { %v2018_v30 = vsel %vm2016_vm3, %v2015_v63, %v2008_v46 }
 0x526   :  { %v2020_v29 = vadd.f32 %v2207_v28, %v2018_v30 }
 0x528   :  { %2022 = vst.msk [vmem:[#allocation9 + $0x8] sm:$0xff] %vm100_vm0, %v2020_v29 }
 0x52a   :  { %v2006_v49 = vpop.permute.xlu0 %2005 }
 0x52b   :  { %v2017_v50 = vsel %vm2016_vm3, %v2014_v39, %v2006_v49 }
 0x52c   :  { %v2019_v58 = vadd.f32 %v2208_v51, %v2017_v50 }
 0x52e   :  { %2021 = vst.msk [vmem:[#allocation9] sm:$0xff] %vm100_vm0, %v2019_v58 }
 0x52f   :  { %2035 = dma.vmem_to_hbm [thread:$0]  %s2028_s28, 256, %s2030_s9, [#allocation5], %s2312_s13, %s2312_s13, %s2313_s14  }
 0x530   :  { %2309 = dma.done.wait [#allocation5], 256  }
 0x531   :  { %2310 = vsyncadd [#allocation5], 4294967040 }
 0x532   :  { %2040 = vsyncpa [#allocation4], 1 }
 0x533   :  { %2041 = vsyncpa [#allocation7], 1 }
 0x534   :  { %2042 = vsyncpa [#allocation5], 1 }

</bundles_post_ra>
